<compile_context>
chip_gen: v6e
topology: v6e:2x2x1
jax: 0.10.0
libtpu: 0.0.40
codegen_flags: <defaults>
</compile_context>

<pallas_src>
import functools

import jax
import jax.numpy as jnp
from jax import lax
from jax.experimental import pallas as pl
from jax.experimental.pallas import tpu as pltpu

_K = 5      # conv kernel size
_PAD = 2    # conv padding ("same")


def _largest_divisor_leq(n, cap):
    d = max(1, min(n, cap))
    while n % d:
        d -= 1
    return d


def _sa_kernel(x_ref, w_ref, o_ref, *, h, w, c, cc):
    """x_ref/o_ref: (Bblk, C, H*W) VMEM.  w_ref: SMEM (51,) f32 conv params."""
    bblk = x_ref.shape[0]
    hw = h * w
    f32 = jnp.float32
    nchunks = c // cc

    # ---- fused channel max + mean (single pass over the slab, f32 accum) ----
    def red_body(i, carry):
        mx_acc, sm_acc = carry
        c0 = pl.multiple_of(i * cc, cc)
        xc = x_ref[:, pl.ds(c0, cc), :].astype(f32)           # (bblk, cc, hw)
        return jnp.maximum(mx_acc, xc), sm_acc + xc

    if nchunks == 1:
        x0 = x_ref[...].astype(f32)                           # c == cc (<= 8)
        mx_acc, sm_acc = x0, x0
    else:
        x0 = x_ref[:, pl.ds(0, cc), :].astype(f32)
        mx_acc, sm_acc = lax.fori_loop(1, nchunks, red_body, (x0, x0),
                                       unroll=(nchunks <= 16))

    mx = jnp.max(mx_acc, axis=1, keepdims=True)               # (bblk, 1, hw)
    mn = jnp.sum(sm_acc, axis=1, keepdims=True) * f32(1.0 / c)

    # ---- Conv2d(2 -> 1, k=5, padding=2) evaluated in flat lane space ----
    # Horizontal (kw) taps: zero-filled lane shifts, masked where the shift
    # would cross a row boundary.  Hoisted once per dx (5 shifts per map).
    col = lax.broadcasted_iota(jnp.int32, (1, 1, hw), 2) % w
    zl = jnp.zeros((bblk, 1, _PAD), f32)
    mxp = jnp.concatenate([zl, mx, zl], axis=2)               # (bblk, 1, hw + 4)
    mnp = jnp.concatenate([zl, mn, zl], axis=2)

    mx_dx, mn_dx = [], []
    for dx in range(-_PAD, _PAD + 1):
        sx = mxp[:, :, _PAD + dx:_PAD + dx + hw]              # map[p + dx], 0-filled
        sn = mnp[:, :, _PAD + dx:_PAD + dx + hw]
        if dx != 0:
            valid = jnp.logical_and(col + dx >= 0, col + dx < w)
            sx = jnp.where(valid, sx, 0.0)
            sn = jnp.where(valid, sn, 0.0)
        mx_dx.append(sx)
        mn_dx.append(sn)

    # Vertical (kh) taps: combine the 5 dx taps of one kernel row first (two
    # independent 5-term chains), then a single zero-filled lane shift by dy*w.
    zr = jnp.zeros((bblk, 1, _PAD * w), f32)
    conv = jnp.full((bblk, 1, hw), w_ref[2 * _K * _K], dtype=f32)   # bias
    for dy in range(-_PAD, _PAD + 1):
        kh = dy + _PAD
        row_mx = w_ref[kh * _K + 0] * mx_dx[0]                # channel 0 = max map
        row_mn = w_ref[_K * _K + kh * _K + 0] * mn_dx[0]      # channel 1 = mean map
        for kw in range(1, _K):
            row_mx = row_mx + w_ref[kh * _K + kw] * mx_dx[kw]
            row_mn = row_mn + w_ref[_K * _K + kh * _K + kw] * mn_dx[kw]
        row = row_mx + row_mn                                 # (bblk, 1, hw)
        rowp = jnp.concatenate([zr, row, zr], axis=2)         # (bblk, 1, hw + 4w)
        start = _PAD * w + dy * w
        conv = conv + rowp[:, :, start:start + hw]            # row[p + dy*w], 0-filled

    scale = jax.nn.sigmoid(conv)                              # (bblk, 1, hw) f32

    # ---- out = x * scale: f32 math, chunked over C, single cast on store ----
    def mul_body(i, _):
        c0 = pl.multiple_of(i * cc, cc)
        xc = x_ref[:, pl.ds(c0, cc), :].astype(f32)
        o_ref[:, pl.ds(c0, cc), :] = (xc * scale).astype(o_ref.dtype)
        return 0

    if nchunks == 1:
        o_ref[...] = (x_ref[...].astype(f32) * scale).astype(o_ref.dtype)
    else:
        lax.fori_loop(0, nchunks, mul_body, 0, unroll=(nchunks <= 16))


def spatial_attention(x, conv_w, conv_b, *, bblk=None):
    """x: (B, C, H, W) NCHW.  conv_w: (1, 2, 5, 5) OIHW.  conv_b: (1,)."""
    B, C, H, W = x.shape
    assert conv_w.shape == (1, 2, _K, _K) and conv_b.shape == (1,)
    HW = H * W
    itemsize = x.dtype.itemsize
    cc = _largest_divisor_leq(C, 8)                           # channel chunk

    # ---- generation-aware VMEM budgeting ----
    try:
        vmem_cap = int(pltpu.get_tpu_info().vmem_capacity_bytes)
    except Exception:
        vmem_cap = 64 * 1024 * 1024                           # conservative (v7x/core)
    if vmem_cap >= 100 * 1024 * 1024:                         # v5e / v6e: 128 MiB
        budget, cap = 40 * 1024 * 1024, 96 * 1024 * 1024
    else:                                                     # v7x: 64 MiB per core
        budget, cap = 18 * 1024 * 1024, 46 * 1024 * 1024

    def _need_bytes(nb):
        io = 4 * nb * C * HW * itemsize          # x + o blocks, double-buffered
        red = 3 * cc * nb * HW * 4               # chunk read + max/sum accumulators
        conv = 24 * nb * HW * 4                  # shifted maps, row temps, scale
        mul = 2 * cc * nb * HW * 4               # f32 chunk product on the store path
        return io + red + conv + mul

    if bblk is None:
        # Keep the 'parallel' grid axis >= 2 steps so multi-TensorCore parts
        # (v7x) can split the batch; costs one extra ~0.35 us step elsewhere.
        max_bblk = B if B < 2 else max(1, B // 2)
        bblk = _largest_divisor_leq(B, max_bblk)
        while bblk > 1 and _need_bytes(bblk) > budget:
            bblk -= 1
            while B % bblk:
                bblk -= 1
    assert B % bblk == 0 and bblk >= 1
    # TODO(synk): add a C-chunk / H-band grid fallback for very large C*H*W
    # images where even a single image (bblk == 1) exceeds the VMEM budget.

    need = _need_bytes(bblk)
    vmem_limit = int(min(max(need + (4 << 20), 32 << 20), cap))

    # Conv params flattened into one small SMEM vector of scalar taps + bias.
    w_flat = jnp.concatenate(
        [conv_w.reshape(-1).astype(jnp.float32),
         conv_b.reshape(-1).astype(jnp.float32)])             # (51,)

    x_flat = x.reshape(B, C, HW)                              # lane-dense layout

    kernel = functools.partial(_sa_kernel, h=H, w=W, c=C, cc=cc)

    out_flat = pl.pallas_call(
        kernel,
        out_shape=jax.ShapeDtypeStruct((B, C, HW), x.dtype),
        grid_spec=pltpu.PrefetchScalarGridSpec(
            num_scalar_prefetch=0,
            grid=(B // bblk,),
            in_specs=[
                pl.BlockSpec((bblk, C, HW), lambda b: (b, 0, 0)),       # x
                pl.BlockSpec(memory_space=pltpu.MemorySpace.SMEM),      # conv params
            ],
            out_specs=pl.BlockSpec((bblk, C, HW), lambda b: (b, 0, 0)),
        ),
        compiler_params=pltpu.CompilerParams(
            dimension_semantics=("parallel",),
            vmem_limit_bytes=vmem_limit,
        ),
    )(x_flat, w_flat)

    return out_flat.reshape(B, C, H, W)


def _reference(x, conv_w, conv_b):
    # Pure-JAX reference matching the PyTorch forward.
    mx = jnp.max(x, axis=1, keepdims=True)
    mn = jnp.mean(x.astype(jnp.float32), axis=1, keepdims=True).astype(x.dtype)
    cm = jnp.concatenate([mx, mn], axis=1)                    # (B, 2, H, W)
    y = jax.lax.conv_general_dilated(
        cm.astype(jnp.float32), conv_w.astype(jnp.float32),
        window_strides=(1, 1), padding=((_PAD, _PAD), (_PAD, _PAD)),
        dimension_numbers=("NCHW", "OIHW", "NCHW"))
    scale = jax.nn.sigmoid(y + conv_b.reshape(1, 1, 1, 1))
    return (x.astype(jnp.float32) * scale).astype(x.dtype)


if __name__ == "__main__":
    B, C, H, W = 2, 4, 16, 16

    key = jax.random.PRNGKey(0)
    k1, k2, k3 = jax.random.split(key, 3)
    x = jax.random.normal(k1, (B, C, H, W), dtype=jnp.float32)
    conv_w = jax.random.normal(k2, (1, 2, _K, _K), dtype=jnp.float32) * 0.1
    conv_b = jax.random.normal(k3, (1,), dtype=jnp.float32) * 0.1

    out = spatial_attention(x, conv_w, conv_b)
    jax.block_until_ready(out)

    ref = _reference(x, conv_w, conv_b)
    assert out.shape == ref.shape
    assert jnp.allclose(out, ref, atol=1e-5, rtol=1e-5), "mismatch vs reference"

    print("KERNEL_OK")
</pallas_src>

<mosaic_0001>
module attributes {stable_mosaic.version = 11 : i64} {
  func.func @_sa_kernel(%arg0: i32, %arg1: memref<1x4x256xf32, #tpu.memory_space<vmem>>, %arg2: memref<51xf32, #tpu.memory_space<smem>>, %arg3: memref<1x4x256xf32, #tpu.memory_space<vmem>>) attributes {dimension_semantics = [#tpu.dimension_semantics<parallel>], iteration_bounds = array<i64: 2>, scalar_prefetch = 0 : i64, scratch_operands = 0 : i64, tpu.core_type = #tpu.core_type<tc>, window_params = [{transform_indices = @transform_0, window_bounds = array<i64: 1, 4, 256>}, {transform_indices = @transform_1, window_bounds = array<i64: 51>}, {transform_indices = @transform_2, window_bounds = array<i64: 1, 4, 256>}]} {
    %c0 = arith.constant 0 : index
    %c0_0 = arith.constant 0 : index
    %c0_1 = arith.constant 0 : index
    %0 = vector.load %arg1[%c0, %c0_0, %c0_1] : memref<1x4x256xf32, #tpu.memory_space<vmem>>, vector<1x4x256xf32>
    %cst = arith.constant dense<0xFF800000> : vector<1x256xf32>
    %1 = vector.multi_reduction <maximumf>, %0, %cst [1] : vector<1x4x256xf32> to vector<1x256xf32>
    %2 = vector.shape_cast %1 : vector<1x256xf32> to vector<1x1x256xf32>
    %cst_2 = arith.constant dense<0.000000e+00> : vector<1x256xf32>
    %3 = vector.multi_reduction <add>, %0, %cst_2 [1] : vector<1x4x256xf32> to vector<1x256xf32>
    %4 = vector.shape_cast %3 : vector<1x256xf32> to vector<1x1x256xf32>
    %cst_3 = arith.constant 2.500000e-01 : f32
    %5 = vector.broadcast %cst_3 : f32 to vector<1x1x256xf32>
    %6 = arith.mulf %4, %5 : vector<1x1x256xf32>
    %7 = tpu.iota {dimensions = array<i32: 2>} : vector<1x1x256xi32>
    %c16_i32 = arith.constant 16 : i32
    %c0_i32 = arith.constant 0 : i32
    %8 = arith.cmpi eq, %c16_i32, %c0_i32 : i32
    %c1_i32 = arith.constant 1 : i32
    %9 = arith.select %8, %c1_i32, %c16_i32 : i32
    %10 = vector.broadcast %9 : i32 to vector<1x1x256xi32>
    %11 = arith.remsi %7, %10 : vector<1x1x256xi32>
    %c0_i32_4 = arith.constant 0 : i32
    %12 = vector.broadcast %c0_i32_4 : i32 to vector<1x1x256xi32>
    %13 = arith.cmpi ne, %11, %12 : vector<1x1x256xi32>
    %c0_i32_5 = arith.constant 0 : i32
    %14 = vector.broadcast %c0_i32_5 : i32 to vector<1x1x256xi32>
    %15 = arith.cmpi slt, %11, %14 : vector<1x1x256xi32>
    %c0_i32_6 = arith.constant 0 : i32
    %16 = arith.cmpi slt, %9, %c0_i32_6 : i32
    %17 = vector.broadcast %16 : i1 to vector<1x1x256xi1>
    %18 = vector.broadcast %17 : vector<1x1x256xi1> to vector<1x1x256xi1>
    %19 = arith.xori %15, %18 : vector<1x1x256xi1>
    %20 = arith.andi %19, %13 : vector<1x1x256xi1>
    %21 = vector.broadcast %9 : i32 to vector<1x1x256xi32>
    %22 = arith.addi %11, %21 : vector<1x1x256xi32>
    %23 = arith.select %20, %22, %11 : vector<1x1x256xi1>, vector<1x1x256xi32>
    %cst_7 = arith.constant 0.000000e+00 : f32
    %24 = vector.broadcast %cst_7 : f32 to vector<1x1x2xf32>
    %25 = tpu.concatenate %24, %2, %24 in 2 : vector<1x1x2xf32>, vector<1x1x256xf32>, vector<1x1x2xf32> -> vector<1x1x260xf32>
    %26 = tpu.concatenate %24, %6, %24 in 2 : vector<1x1x2xf32>, vector<1x1x256xf32>, vector<1x1x2xf32> -> vector<1x1x260xf32>
    %27 = vector.extract_strided_slice %25 {offsets = [0, 0, 0], sizes = [1, 1, 256], strides = [1, 1, 1]} : vector<1x1x260xf32> to vector<1x1x256xf32>
    %28 = vector.extract_strided_slice %26 {offsets = [0, 0, 0], sizes = [1, 1, 256], strides = [1, 1, 1]} : vector<1x1x260xf32> to vector<1x1x256xf32>
    %c-2_i32 = arith.constant -2 : i32
    %29 = vector.broadcast %c-2_i32 : i32 to vector<1x1x256xi32>
    %30 = arith.addi %23, %29 : vector<1x1x256xi32>
    %c0_i32_8 = arith.constant 0 : i32
    %31 = vector.broadcast %c0_i32_8 : i32 to vector<1x1x256xi32>
    %32 = arith.cmpi sge, %30, %31 : vector<1x1x256xi32>
    %c-2_i32_9 = arith.constant -2 : i32
    %33 = vector.broadcast %c-2_i32_9 : i32 to vector<1x1x256xi32>
    %34 = arith.addi %23, %33 : vector<1x1x256xi32>
    %c16_i32_10 = arith.constant 16 : i32
    %35 = vector.broadcast %c16_i32_10 : i32 to vector<1x1x256xi32>
    %36 = arith.cmpi slt, %34, %35 : vector<1x1x256xi32>
    %37 = arith.andi %32, %36 : vector<1x1x256xi1>
    %cst_11 = arith.constant 0.000000e+00 : f32
    %38 = vector.broadcast %cst_11 : f32 to vector<1x1x256xf32>
    %39 = arith.select %37, %27, %38 : vector<1x1x256xi1>, vector<1x1x256xf32>
    %cst_12 = arith.constant 0.000000e+00 : f32
    %40 = vector.broadcast %cst_12 : f32 to vector<1x1x256xf32>
    %41 = arith.select %37, %28, %40 : vector<1x1x256xi1>, vector<1x1x256xf32>
    %42 = vector.extract_strided_slice %25 {offsets = [0, 0, 1], sizes = [1, 1, 256], strides = [1, 1, 1]} : vector<1x1x260xf32> to vector<1x1x256xf32>
    %43 = vector.extract_strided_slice %26 {offsets = [0, 0, 1], sizes = [1, 1, 256], strides = [1, 1, 1]} : vector<1x1x260xf32> to vector<1x1x256xf32>
    %c-1_i32 = arith.constant -1 : i32
    %44 = vector.broadcast %c-1_i32 : i32 to vector<1x1x256xi32>
    %45 = arith.addi %23, %44 : vector<1x1x256xi32>
    %c0_i32_13 = arith.constant 0 : i32
    %46 = vector.broadcast %c0_i32_13 : i32 to vector<1x1x256xi32>
    %47 = arith.cmpi sge, %45, %46 : vector<1x1x256xi32>
    %c-1_i32_14 = arith.constant -1 : i32
    %48 = vector.broadcast %c-1_i32_14 : i32 to vector<1x1x256xi32>
    %49 = arith.addi %23, %48 : vector<1x1x256xi32>
    %c16_i32_15 = arith.constant 16 : i32
    %50 = vector.broadcast %c16_i32_15 : i32 to vector<1x1x256xi32>
    %51 = arith.cmpi slt, %49, %50 : vector<1x1x256xi32>
    %52 = arith.andi %47, %51 : vector<1x1x256xi1>
    %cst_16 = arith.constant 0.000000e+00 : f32
    %53 = vector.broadcast %cst_16 : f32 to vector<1x1x256xf32>
    %54 = arith.select %52, %42, %53 : vector<1x1x256xi1>, vector<1x1x256xf32>
    %cst_17 = arith.constant 0.000000e+00 : f32
    %55 = vector.broadcast %cst_17 : f32 to vector<1x1x256xf32>
    %56 = arith.select %52, %43, %55 : vector<1x1x256xi1>, vector<1x1x256xf32>
    %57 = vector.extract_strided_slice %25 {offsets = [0, 0, 2], sizes = [1, 1, 256], strides = [1, 1, 1]} : vector<1x1x260xf32> to vector<1x1x256xf32>
    %58 = vector.extract_strided_slice %26 {offsets = [0, 0, 2], sizes = [1, 1, 256], strides = [1, 1, 1]} : vector<1x1x260xf32> to vector<1x1x256xf32>
    %59 = vector.extract_strided_slice %25 {offsets = [0, 0, 3], sizes = [1, 1, 256], strides = [1, 1, 1]} : vector<1x1x260xf32> to vector<1x1x256xf32>
    %60 = vector.extract_strided_slice %26 {offsets = [0, 0, 3], sizes = [1, 1, 256], strides = [1, 1, 1]} : vector<1x1x260xf32> to vector<1x1x256xf32>
    %c1_i32_18 = arith.constant 1 : i32
    %61 = vector.broadcast %c1_i32_18 : i32 to vector<1x1x256xi32>
    %62 = arith.addi %23, %61 : vector<1x1x256xi32>
    %c0_i32_19 = arith.constant 0 : i32
    %63 = vector.broadcast %c0_i32_19 : i32 to vector<1x1x256xi32>
    %64 = arith.cmpi sge, %62, %63 : vector<1x1x256xi32>
    %c1_i32_20 = arith.constant 1 : i32
    %65 = vector.broadcast %c1_i32_20 : i32 to vector<1x1x256xi32>
    %66 = arith.addi %23, %65 : vector<1x1x256xi32>
    %c16_i32_21 = arith.constant 16 : i32
    %67 = vector.broadcast %c16_i32_21 : i32 to vector<1x1x256xi32>
    %68 = arith.cmpi slt, %66, %67 : vector<1x1x256xi32>
    %69 = arith.andi %64, %68 : vector<1x1x256xi1>
    %cst_22 = arith.constant 0.000000e+00 : f32
    %70 = vector.broadcast %cst_22 : f32 to vector<1x1x256xf32>
    %71 = arith.select %69, %59, %70 : vector<1x1x256xi1>, vector<1x1x256xf32>
    %cst_23 = arith.constant 0.000000e+00 : f32
    %72 = vector.broadcast %cst_23 : f32 to vector<1x1x256xf32>
    %73 = arith.select %69, %60, %72 : vector<1x1x256xi1>, vector<1x1x256xf32>
    %74 = vector.extract_strided_slice %25 {offsets = [0, 0, 4], sizes = [1, 1, 256], strides = [1, 1, 1]} : vector<1x1x260xf32> to vector<1x1x256xf32>
    %75 = vector.extract_strided_slice %26 {offsets = [0, 0, 4], sizes = [1, 1, 256], strides = [1, 1, 1]} : vector<1x1x260xf32> to vector<1x1x256xf32>
    %c2_i32 = arith.constant 2 : i32
    %76 = vector.broadcast %c2_i32 : i32 to vector<1x1x256xi32>
    %77 = arith.addi %23, %76 : vector<1x1x256xi32>
    %c0_i32_24 = arith.constant 0 : i32
    %78 = vector.broadcast %c0_i32_24 : i32 to vector<1x1x256xi32>
    %79 = arith.cmpi sge, %77, %78 : vector<1x1x256xi32>
    %c2_i32_25 = arith.constant 2 : i32
    %80 = vector.broadcast %c2_i32_25 : i32 to vector<1x1x256xi32>
    %81 = arith.addi %23, %80 : vector<1x1x256xi32>
    %c16_i32_26 = arith.constant 16 : i32
    %82 = vector.broadcast %c16_i32_26 : i32 to vector<1x1x256xi32>
    %83 = arith.cmpi slt, %81, %82 : vector<1x1x256xi32>
    %84 = arith.andi %79, %83 : vector<1x1x256xi1>
    %cst_27 = arith.constant 0.000000e+00 : f32
    %85 = vector.broadcast %cst_27 : f32 to vector<1x1x256xf32>
    %86 = arith.select %84, %74, %85 : vector<1x1x256xi1>, vector<1x1x256xf32>
    %cst_28 = arith.constant 0.000000e+00 : f32
    %87 = vector.broadcast %cst_28 : f32 to vector<1x1x256xf32>
    %88 = arith.select %84, %75, %87 : vector<1x1x256xi1>, vector<1x1x256xf32>
    %cst_29 = arith.constant 0.000000e+00 : f32
    %89 = vector.broadcast %cst_29 : f32 to vector<1x1x32xf32>
    %c50 = arith.constant 50 : index
    %90 = memref.load %arg2[%c50] : memref<51xf32, #tpu.memory_space<smem>>
    %91 = vector.broadcast %90 : f32 to vector<1x1x256xf32>
    %c0_30 = arith.constant 0 : index
    %92 = memref.load %arg2[%c0_30] : memref<51xf32, #tpu.memory_space<smem>>
    %93 = vector.broadcast %92 : f32 to vector<1x1x256xf32>
    %94 = arith.mulf %93, %39 : vector<1x1x256xf32>
    %c25 = arith.constant 25 : index
    %95 = memref.load %arg2[%c25] : memref<51xf32, #tpu.memory_space<smem>>
    %96 = vector.broadcast %95 : f32 to vector<1x1x256xf32>
    %97 = arith.mulf %96, %41 : vector<1x1x256xf32>
    %c1 = arith.constant 1 : index
    %98 = memref.load %arg2[%c1] : memref<51xf32, #tpu.memory_space<smem>>
    %99 = vector.broadcast %98 : f32 to vector<1x1x256xf32>
    %100 = arith.mulf %99, %54 : vector<1x1x256xf32>
    %101 = arith.addf %94, %100 : vector<1x1x256xf32>
    %c26 = arith.constant 26 : index
    %102 = memref.load %arg2[%c26] : memref<51xf32, #tpu.memory_space<smem>>
    %103 = vector.broadcast %102 : f32 to vector<1x1x256xf32>
    %104 = arith.mulf %103, %56 : vector<1x1x256xf32>
    %105 = arith.addf %97, %104 : vector<1x1x256xf32>
    %c2 = arith.constant 2 : index
    %106 = memref.load %arg2[%c2] : memref<51xf32, #tpu.memory_space<smem>>
    %107 = vector.broadcast %106 : f32 to vector<1x1x256xf32>
    %108 = arith.mulf %107, %57 : vector<1x1x256xf32>
    %109 = arith.addf %101, %108 : vector<1x1x256xf32>
    %c27 = arith.constant 27 : index
    %110 = memref.load %arg2[%c27] : memref<51xf32, #tpu.memory_space<smem>>
    %111 = vector.broadcast %110 : f32 to vector<1x1x256xf32>
    %112 = arith.mulf %111, %58 : vector<1x1x256xf32>
    %113 = arith.addf %105, %112 : vector<1x1x256xf32>
    %c3 = arith.constant 3 : index
    %114 = memref.load %arg2[%c3] : memref<51xf32, #tpu.memory_space<smem>>
    %115 = vector.broadcast %114 : f32 to vector<1x1x256xf32>
    %116 = arith.mulf %115, %71 : vector<1x1x256xf32>
    %117 = arith.addf %109, %116 : vector<1x1x256xf32>
    %c28 = arith.constant 28 : index
    %118 = memref.load %arg2[%c28] : memref<51xf32, #tpu.memory_space<smem>>
    %119 = vector.broadcast %118 : f32 to vector<1x1x256xf32>
    %120 = arith.mulf %119, %73 : vector<1x1x256xf32>
    %121 = arith.addf %113, %120 : vector<1x1x256xf32>
    %c4 = arith.constant 4 : index
    %122 = memref.load %arg2[%c4] : memref<51xf32, #tpu.memory_space<smem>>
    %123 = vector.broadcast %122 : f32 to vector<1x1x256xf32>
    %124 = arith.mulf %123, %86 : vector<1x1x256xf32>
    %125 = arith.addf %117, %124 : vector<1x1x256xf32>
    %c29 = arith.constant 29 : index
    %126 = memref.load %arg2[%c29] : memref<51xf32, #tpu.memory_space<smem>>
    %127 = vector.broadcast %126 : f32 to vector<1x1x256xf32>
    %128 = arith.mulf %127, %88 : vector<1x1x256xf32>
    %129 = arith.addf %121, %128 : vector<1x1x256xf32>
    %130 = arith.addf %125, %129 : vector<1x1x256xf32>
    %131 = tpu.concatenate %89, %130, %89 in 2 : vector<1x1x32xf32>, vector<1x1x256xf32>, vector<1x1x32xf32> -> vector<1x1x320xf32>
    %132 = vector.extract_strided_slice %131 {offsets = [0, 0, 0], sizes = [1, 1, 256], strides = [1, 1, 1]} : vector<1x1x320xf32> to vector<1x1x256xf32>
    %133 = arith.addf %91, %132 : vector<1x1x256xf32>
    %c5 = arith.constant 5 : index
    %134 = memref.load %arg2[%c5] : memref<51xf32, #tpu.memory_space<smem>>
    %135 = vector.broadcast %134 : f32 to vector<1x1x256xf32>
    %136 = arith.mulf %135, %39 : vector<1x1x256xf32>
    %c30 = arith.constant 30 : index
    %137 = memref.load %arg2[%c30] : memref<51xf32, #tpu.memory_space<smem>>
    %138 = vector.broadcast %137 : f32 to vector<1x1x256xf32>
    %139 = arith.mulf %138, %41 : vector<1x1x256xf32>
    %c6 = arith.constant 6 : index
    %140 = memref.load %arg2[%c6] : memref<51xf32, #tpu.memory_space<smem>>
    %141 = vector.broadcast %140 : f32 to vector<1x1x256xf32>
    %142 = arith.mulf %141, %54 : vector<1x1x256xf32>
    %143 = arith.addf %136, %142 : vector<1x1x256xf32>
    %c31 = arith.constant 31 : index
    %144 = memref.load %arg2[%c31] : memref<51xf32, #tpu.memory_space<smem>>
    %145 = vector.broadcast %144 : f32 to vector<1x1x256xf32>
    %146 = arith.mulf %145, %56 : vector<1x1x256xf32>
    %147 = arith.addf %139, %146 : vector<1x1x256xf32>
    %c7 = arith.constant 7 : index
    %148 = memref.load %arg2[%c7] : memref<51xf32, #tpu.memory_space<smem>>
    %149 = vector.broadcast %148 : f32 to vector<1x1x256xf32>
    %150 = arith.mulf %149, %57 : vector<1x1x256xf32>
    %151 = arith.addf %143, %150 : vector<1x1x256xf32>
    %c32 = arith.constant 32 : index
    %152 = memref.load %arg2[%c32] : memref<51xf32, #tpu.memory_space<smem>>
    %153 = vector.broadcast %152 : f32 to vector<1x1x256xf32>
    %154 = arith.mulf %153, %58 : vector<1x1x256xf32>
    %155 = arith.addf %147, %154 : vector<1x1x256xf32>
    %c8 = arith.constant 8 : index
    %156 = memref.load %arg2[%c8] : memref<51xf32, #tpu.memory_space<smem>>
    %157 = vector.broadcast %156 : f32 to vector<1x1x256xf32>
    %158 = arith.mulf %157, %71 : vector<1x1x256xf32>
    %159 = arith.addf %151, %158 : vector<1x1x256xf32>
    %c33 = arith.constant 33 : index
    %160 = memref.load %arg2[%c33] : memref<51xf32, #tpu.memory_space<smem>>
    %161 = vector.broadcast %160 : f32 to vector<1x1x256xf32>
    %162 = arith.mulf %161, %73 : vector<1x1x256xf32>
    %163 = arith.addf %155, %162 : vector<1x1x256xf32>
    %c9 = arith.constant 9 : index
    %164 = memref.load %arg2[%c9] : memref<51xf32, #tpu.memory_space<smem>>
    %165 = vector.broadcast %164 : f32 to vector<1x1x256xf32>
    %166 = arith.mulf %165, %86 : vector<1x1x256xf32>
    %167 = arith.addf %159, %166 : vector<1x1x256xf32>
    %c34 = arith.constant 34 : index
    %168 = memref.load %arg2[%c34] : memref<51xf32, #tpu.memory_space<smem>>
    %169 = vector.broadcast %168 : f32 to vector<1x1x256xf32>
    %170 = arith.mulf %169, %88 : vector<1x1x256xf32>
    %171 = arith.addf %163, %170 : vector<1x1x256xf32>
    %172 = arith.addf %167, %171 : vector<1x1x256xf32>
    %173 = tpu.concatenate %89, %172, %89 in 2 : vector<1x1x32xf32>, vector<1x1x256xf32>, vector<1x1x32xf32> -> vector<1x1x320xf32>
    %174 = vector.extract_strided_slice %173 {offsets = [0, 0, 16], sizes = [1, 1, 256], strides = [1, 1, 1]} : vector<1x1x320xf32> to vector<1x1x256xf32>
    %175 = arith.addf %133, %174 : vector<1x1x256xf32>
    %c10 = arith.constant 10 : index
    %176 = memref.load %arg2[%c10] : memref<51xf32, #tpu.memory_space<smem>>
    %177 = vector.broadcast %176 : f32 to vector<1x1x256xf32>
    %178 = arith.mulf %177, %39 : vector<1x1x256xf32>
    %c35 = arith.constant 35 : index
    %179 = memref.load %arg2[%c35] : memref<51xf32, #tpu.memory_space<smem>>
    %180 = vector.broadcast %179 : f32 to vector<1x1x256xf32>
    %181 = arith.mulf %180, %41 : vector<1x1x256xf32>
    %c11 = arith.constant 11 : index
    %182 = memref.load %arg2[%c11] : memref<51xf32, #tpu.memory_space<smem>>
    %183 = vector.broadcast %182 : f32 to vector<1x1x256xf32>
    %184 = arith.mulf %183, %54 : vector<1x1x256xf32>
    %185 = arith.addf %178, %184 : vector<1x1x256xf32>
    %c36 = arith.constant 36 : index
    %186 = memref.load %arg2[%c36] : memref<51xf32, #tpu.memory_space<smem>>
    %187 = vector.broadcast %186 : f32 to vector<1x1x256xf32>
    %188 = arith.mulf %187, %56 : vector<1x1x256xf32>
    %189 = arith.addf %181, %188 : vector<1x1x256xf32>
    %c12 = arith.constant 12 : index
    %190 = memref.load %arg2[%c12] : memref<51xf32, #tpu.memory_space<smem>>
    %191 = vector.broadcast %190 : f32 to vector<1x1x256xf32>
    %192 = arith.mulf %191, %57 : vector<1x1x256xf32>
    %193 = arith.addf %185, %192 : vector<1x1x256xf32>
    %c37 = arith.constant 37 : index
    %194 = memref.load %arg2[%c37] : memref<51xf32, #tpu.memory_space<smem>>
    %195 = vector.broadcast %194 : f32 to vector<1x1x256xf32>
    %196 = arith.mulf %195, %58 : vector<1x1x256xf32>
    %197 = arith.addf %189, %196 : vector<1x1x256xf32>
    %c13 = arith.constant 13 : index
    %198 = memref.load %arg2[%c13] : memref<51xf32, #tpu.memory_space<smem>>
    %199 = vector.broadcast %198 : f32 to vector<1x1x256xf32>
    %200 = arith.mulf %199, %71 : vector<1x1x256xf32>
    %201 = arith.addf %193, %200 : vector<1x1x256xf32>
    %c38 = arith.constant 38 : index
    %202 = memref.load %arg2[%c38] : memref<51xf32, #tpu.memory_space<smem>>
    %203 = vector.broadcast %202 : f32 to vector<1x1x256xf32>
    %204 = arith.mulf %203, %73 : vector<1x1x256xf32>
    %205 = arith.addf %197, %204 : vector<1x1x256xf32>
    %c14 = arith.constant 14 : index
    %206 = memref.load %arg2[%c14] : memref<51xf32, #tpu.memory_space<smem>>
    %207 = vector.broadcast %206 : f32 to vector<1x1x256xf32>
    %208 = arith.mulf %207, %86 : vector<1x1x256xf32>
    %209 = arith.addf %201, %208 : vector<1x1x256xf32>
    %c39 = arith.constant 39 : index
    %210 = memref.load %arg2[%c39] : memref<51xf32, #tpu.memory_space<smem>>
    %211 = vector.broadcast %210 : f32 to vector<1x1x256xf32>
    %212 = arith.mulf %211, %88 : vector<1x1x256xf32>
    %213 = arith.addf %205, %212 : vector<1x1x256xf32>
    %214 = arith.addf %209, %213 : vector<1x1x256xf32>
    %215 = tpu.concatenate %89, %214, %89 in 2 : vector<1x1x32xf32>, vector<1x1x256xf32>, vector<1x1x32xf32> -> vector<1x1x320xf32>
    %216 = vector.extract_strided_slice %215 {offsets = [0, 0, 32], sizes = [1, 1, 256], strides = [1, 1, 1]} : vector<1x1x320xf32> to vector<1x1x256xf32>
    %217 = arith.addf %175, %216 : vector<1x1x256xf32>
    %c15 = arith.constant 15 : index
    %218 = memref.load %arg2[%c15] : memref<51xf32, #tpu.memory_space<smem>>
    %219 = vector.broadcast %218 : f32 to vector<1x1x256xf32>
    %220 = arith.mulf %219, %39 : vector<1x1x256xf32>
    %c40 = arith.constant 40 : index
    %221 = memref.load %arg2[%c40] : memref<51xf32, #tpu.memory_space<smem>>
    %222 = vector.broadcast %221 : f32 to vector<1x1x256xf32>
    %223 = arith.mulf %222, %41 : vector<1x1x256xf32>
    %c16 = arith.constant 16 : index
    %224 = memref.load %arg2[%c16] : memref<51xf32, #tpu.memory_space<smem>>
    %225 = vector.broadcast %224 : f32 to vector<1x1x256xf32>
    %226 = arith.mulf %225, %54 : vector<1x1x256xf32>
    %227 = arith.addf %220, %226 : vector<1x1x256xf32>
    %c41 = arith.constant 41 : index
    %228 = memref.load %arg2[%c41] : memref<51xf32, #tpu.memory_space<smem>>
    %229 = vector.broadcast %228 : f32 to vector<1x1x256xf32>
    %230 = arith.mulf %229, %56 : vector<1x1x256xf32>
    %231 = arith.addf %223, %230 : vector<1x1x256xf32>
    %c17 = arith.constant 17 : index
    %232 = memref.load %arg2[%c17] : memref<51xf32, #tpu.memory_space<smem>>
    %233 = vector.broadcast %232 : f32 to vector<1x1x256xf32>
    %234 = arith.mulf %233, %57 : vector<1x1x256xf32>
    %235 = arith.addf %227, %234 : vector<1x1x256xf32>
    %c42 = arith.constant 42 : index
    %236 = memref.load %arg2[%c42] : memref<51xf32, #tpu.memory_space<smem>>
    %237 = vector.broadcast %236 : f32 to vector<1x1x256xf32>
    %238 = arith.mulf %237, %58 : vector<1x1x256xf32>
    %239 = arith.addf %231, %238 : vector<1x1x256xf32>
    %c18 = arith.constant 18 : index
    %240 = memref.load %arg2[%c18] : memref<51xf32, #tpu.memory_space<smem>>
    %241 = vector.broadcast %240 : f32 to vector<1x1x256xf32>
    %242 = arith.mulf %241, %71 : vector<1x1x256xf32>
    %243 = arith.addf %235, %242 : vector<1x1x256xf32>
    %c43 = arith.constant 43 : index
    %244 = memref.load %arg2[%c43] : memref<51xf32, #tpu.memory_space<smem>>
    %245 = vector.broadcast %244 : f32 to vector<1x1x256xf32>
    %246 = arith.mulf %245, %73 : vector<1x1x256xf32>
    %247 = arith.addf %239, %246 : vector<1x1x256xf32>
    %c19 = arith.constant 19 : index
    %248 = memref.load %arg2[%c19] : memref<51xf32, #tpu.memory_space<smem>>
    %249 = vector.broadcast %248 : f32 to vector<1x1x256xf32>
    %250 = arith.mulf %249, %86 : vector<1x1x256xf32>
    %251 = arith.addf %243, %250 : vector<1x1x256xf32>
    %c44 = arith.constant 44 : index
    %252 = memref.load %arg2[%c44] : memref<51xf32, #tpu.memory_space<smem>>
    %253 = vector.broadcast %252 : f32 to vector<1x1x256xf32>
    %254 = arith.mulf %253, %88 : vector<1x1x256xf32>
    %255 = arith.addf %247, %254 : vector<1x1x256xf32>
    %256 = arith.addf %251, %255 : vector<1x1x256xf32>
    %257 = tpu.concatenate %89, %256, %89 in 2 : vector<1x1x32xf32>, vector<1x1x256xf32>, vector<1x1x32xf32> -> vector<1x1x320xf32>
    %258 = vector.extract_strided_slice %257 {offsets = [0, 0, 48], sizes = [1, 1, 256], strides = [1, 1, 1]} : vector<1x1x320xf32> to vector<1x1x256xf32>
    %259 = arith.addf %217, %258 : vector<1x1x256xf32>
    %c20 = arith.constant 20 : index
    %260 = memref.load %arg2[%c20] : memref<51xf32, #tpu.memory_space<smem>>
    %261 = vector.broadcast %260 : f32 to vector<1x1x256xf32>
    %262 = arith.mulf %261, %39 : vector<1x1x256xf32>
    %c45 = arith.constant 45 : index
    %263 = memref.load %arg2[%c45] : memref<51xf32, #tpu.memory_space<smem>>
    %264 = vector.broadcast %263 : f32 to vector<1x1x256xf32>
    %265 = arith.mulf %264, %41 : vector<1x1x256xf32>
    %c21 = arith.constant 21 : index
    %266 = memref.load %arg2[%c21] : memref<51xf32, #tpu.memory_space<smem>>
    %267 = vector.broadcast %266 : f32 to vector<1x1x256xf32>
    %268 = arith.mulf %267, %54 : vector<1x1x256xf32>
    %269 = arith.addf %262, %268 : vector<1x1x256xf32>
    %c46 = arith.constant 46 : index
    %270 = memref.load %arg2[%c46] : memref<51xf32, #tpu.memory_space<smem>>
    %271 = vector.broadcast %270 : f32 to vector<1x1x256xf32>
    %272 = arith.mulf %271, %56 : vector<1x1x256xf32>
    %273 = arith.addf %265, %272 : vector<1x1x256xf32>
    %c22 = arith.constant 22 : index
    %274 = memref.load %arg2[%c22] : memref<51xf32, #tpu.memory_space<smem>>
    %275 = vector.broadcast %274 : f32 to vector<1x1x256xf32>
    %276 = arith.mulf %275, %57 : vector<1x1x256xf32>
    %277 = arith.addf %269, %276 : vector<1x1x256xf32>
    %c47 = arith.constant 47 : index
    %278 = memref.load %arg2[%c47] : memref<51xf32, #tpu.memory_space<smem>>
    %279 = vector.broadcast %278 : f32 to vector<1x1x256xf32>
    %280 = arith.mulf %279, %58 : vector<1x1x256xf32>
    %281 = arith.addf %273, %280 : vector<1x1x256xf32>
    %c23 = arith.constant 23 : index
    %282 = memref.load %arg2[%c23] : memref<51xf32, #tpu.memory_space<smem>>
    %283 = vector.broadcast %282 : f32 to vector<1x1x256xf32>
    %284 = arith.mulf %283, %71 : vector<1x1x256xf32>
    %285 = arith.addf %277, %284 : vector<1x1x256xf32>
    %c48 = arith.constant 48 : index
    %286 = memref.load %arg2[%c48] : memref<51xf32, #tpu.memory_space<smem>>
    %287 = vector.broadcast %286 : f32 to vector<1x1x256xf32>
    %288 = arith.mulf %287, %73 : vector<1x1x256xf32>
    %289 = arith.addf %281, %288 : vector<1x1x256xf32>
    %c24 = arith.constant 24 : index
    %290 = memref.load %arg2[%c24] : memref<51xf32, #tpu.memory_space<smem>>
    %291 = vector.broadcast %290 : f32 to vector<1x1x256xf32>
    %292 = arith.mulf %291, %86 : vector<1x1x256xf32>
    %293 = arith.addf %285, %292 : vector<1x1x256xf32>
    %c49 = arith.constant 49 : index
    %294 = memref.load %arg2[%c49] : memref<51xf32, #tpu.memory_space<smem>>
    %295 = vector.broadcast %294 : f32 to vector<1x1x256xf32>
    %296 = arith.mulf %295, %88 : vector<1x1x256xf32>
    %297 = arith.addf %289, %296 : vector<1x1x256xf32>
    %298 = arith.addf %293, %297 : vector<1x1x256xf32>
    %299 = tpu.concatenate %89, %298, %89 in 2 : vector<1x1x32xf32>, vector<1x1x256xf32>, vector<1x1x32xf32> -> vector<1x1x320xf32>
    %300 = vector.extract_strided_slice %299 {offsets = [0, 0, 64], sizes = [1, 1, 256], strides = [1, 1, 1]} : vector<1x1x320xf32> to vector<1x1x256xf32>
    %301 = arith.addf %259, %300 : vector<1x1x256xf32>
    %302 = arith.negf %301 : vector<1x1x256xf32>
    %303 = math.exp %302 : vector<1x1x256xf32>
    %cst_31 = arith.constant 1.000000e+00 : f32
    %304 = vector.broadcast %cst_31 : f32 to vector<1x1x256xf32>
    %305 = arith.addf %304, %303 : vector<1x1x256xf32>
    %306 = arith.divf %304, %305 : vector<1x1x256xf32>
    %c0_32 = arith.constant 0 : index
    %c0_33 = arith.constant 0 : index
    %c0_34 = arith.constant 0 : index
    %307 = vector.load %arg1[%c0_32, %c0_33, %c0_34] : memref<1x4x256xf32, #tpu.memory_space<vmem>>, vector<1x4x256xf32>
    %308 = vector.broadcast %306 : vector<1x1x256xf32> to vector<1x4x256xf32>
    %309 = arith.mulf %307, %308 : vector<1x4x256xf32>
    %c0_35 = arith.constant 0 : index
    %c0_36 = arith.constant 0 : index
    %c0_37 = arith.constant 0 : index
    %310 = vector.load %arg3[%c0_35, %c0_36, %c0_37] : memref<1x4x256xf32, #tpu.memory_space<vmem>>, vector<1x4x256xf32>
    tpu.vector_store %arg3[%c0_35, %c0_36, %c0_37], %309 {strides = array<i32>} : memref<1x4x256xf32, #tpu.memory_space<vmem>>, vector<1x4x256xf32>,
    return
  }
  func.func @transform_0(%arg0: i32) -> (i32, i32, i32) {
    %c0_i32 = arith.constant 0 : i32
    %c0_i32_0 = arith.constant 0 : i32
    %c0_i32_1 = arith.constant 0 : i32
    return %arg0, %c0_i32, %c0_i32_0 : i32, i32, i32
  }
  func.func @transform_1(%arg0: i32) -> i32 {
    %c0_i32 = arith.constant 0 : i32
    %c0_i32_0 = arith.constant 0 : i32
    return %c0_i32 : i32
  }
  func.func @transform_2(%arg0: i32) -> (i32, i32, i32) {
    %c0_i32 = arith.constant 0 : i32
    %c0_i32_0 = arith.constant 0 : i32
    %c0_i32_1 = arith.constant 0 : i32
    return %arg0, %c0_i32, %c0_i32_0 : i32, i32, i32
  }
}

</mosaic_0001>

<bundles_post_ra>
// kernel: tpu_custom_call.1
= control target key start
LH: loop header
LB: loop body
LE: loop exit
PB: predicated region body
PF: predicated region fallthrough
CT: control target
= control target key end

     0   :  { %s2274_s0 = inlined_call_operand.hbm [shape: f32[2,4,256], index: 0, kind: input, shape index: {}]   ;;  %s2275_s1 = inlined_call_operand.vmem [shape: f32[51], index: 1, kind: input, shape index: {}]   ;;  %s2276_s2 = inlined_call_operand.hbm [shape: f32[2,4,256], index: 2, kind: output, shape index: {}]  }
   0x1   :  { %2307 = sst [smem:[#allocation32_spill]] %s2274_s0 }
   0x2   :  { %2308 = sst [smem:[#allocation33_spill]] %s2275_s1 }
   0x3   :  { %2309 = sst [smem:[#allocation34_spill]] %s2276_s2 }
   0x4   :  { %7 = vsyncpa [#allocation3], 0 }
   0x5   :  { %9 = vsyncpa [#allocation3 + $0x1], 0 }
   0x6   :  { %10 = vsyncpa [#allocation5], 0 }
   0x7   :  { %11 = vsyncpa [#allocation4], 0 }
   0x8   :  { %13 = vsyncpa [#allocation4 + $0x1], 0  ;;  %s1337_s9 = smov 0   ;;  %s1339_s10 = smov 0  }
   0x9   :  { %s1341_s11 = smov 0   ;;  %s1343_s12 = smov 0  }
   0xa LB: > { %2310 = sst [smem:[#allocation11_spill]] %s1295_s9  ;;  %s1358_s13 = sadd.s32 4294967295, %s1307_s12   ;;  %s1307_s12 = sphi %s1343_s12, %s2417_s12   ;;  %s1303_s11 = sphi %s1341_s11, %s2420_s11   ;;  %s1299_s10 = sphi %s1339_s10, %s2419_s10   ;;  %s1295_s9 = sphi %s1337_s9, %s2418_s9  }
   0xb   : > { %2311 = sst [smem:[#allocation12_spill]] %s1299_s10  ;;  %s1049_s14 = sadd.s32 4294967294, %s1307_s12  }
   0xc   : > { %2312 = sst [smem:[#allocation13_spill]] %s1303_s11  ;;  %p39_p0 = scmp.ne.s32.totalorder %s1299_s10, %s1295_s9 }
   0xd   : > { %2313 = sst [smem:[#allocation14_spill]] %s1307_s12  ;;  %p2277_p1 = scmp.eq.s32.totalorder %s1358_s13, 0 }
   0xe   : > { %p90_p3 = scmp.eq.s32.totalorder %s1049_s14, 1  ;;  %p1050_p5 = scmp.ge.s32.totalorder %s1307_s12, 1 }
   0xf   : > { %p1367_p4 = por %p2277_p1, %p39_p0  ;;  %p97_p7 = scmp.lt.s32.totalorder %s1307_s12, 3 }
  0x10   : > { %p1372_p6 = por %p90_p3, %p39_p0  ;;  %s2317_s1 = sld [smem:[#allocation33_spill]] }
  0x11   : > { %s2314_s15 = scalar_select %p1367_p4, 1, 0 }
  0x12   : > { %s2315_s16 = scalar_select %p1372_p6, 1, 0 }
  0x13   : > { %p1380_p8 = pnand %p1050_p5, %p97_p7  ;;  %s1388_s21 = sadd.s32 1, %s1307_s12  }
  0x14   : > { %2316 = sst [smem:[#allocation15_spill]] %s2315_s16  ;;  %s23_s23 = ssub.s32 %s1307_s12, %s1388_s21 }
  0x15   : > { %s2318_s20 = scalar_select %p1380_p8, 1, 0 }
  0x16   : > { %s110_s19 = sshll.u32 %s2317_s1, 4  ;;  %p1127_p10 = pneg %p1380_p8  ;;  %s111_s19 = int_to_ptr.vmem [resolvable:$true] %s110_s19 }
  0x17   : > { %2319 = sst [smem:[#allocation16_spill]] %s1388_s21  ;;  %p1398_p12 = scmp.eq.s32.totalorder %s23_s23, 0 }
  0x18   : > { %p1392_p11 = pnand %p1127_p10, %p2277_p1  ;;  %s26_s25 = sadd.s32 1, %s1303_s11 }
  0x19   : > { %p33_p13 = scmp.ne.s32.totalorder %s1303_s11, %s1299_s10  ;;  %s1196_s26 = scalar_lea.vmem %s111_s19, 16 }
  0x1a   : > { %p1197_p0 = scmp.ne.s32.totalorder %s111_s19, %s1196_s26  ;;  %p1198_p3 = pneg %p1392_p11 }
  0x1b   : > { %p1204_p9 = scmp.lt.s32.totalorder %s111_s19, %s111_s19  ;;  %p1205_p2 = scmp.lt.s32.totalorder %s1196_s26, %s1196_s26 }
  0x1c   : > { %p1199_p5 = pnand %p1198_p3, %p1197_p0 }
  0x1d   : > { %p1206_p10 = por %p1205_p2, %p1204_p9 }
  0x1e   : > { %p1200_p7 = pneg %p1199_p5 }
  0x20   : > { %p1207_p1 = pnand %p1206_p10, %p1200_p7 }
  0x22   : > { %1210 = shalt.err (!%p1207_p1)
}
  0x23   : > { %s1309_s27 = smov [#allocation6]   ;;  %p34_p2 = scmp.eq.s32.totalorder %s1307_s12, 0 }
  0x24   : > { %1130 = dma.vmem_to_smem (!%p1392_p11), %s111_s19, 16, %s1309_s27, [#allocation5]  }
  0x25   : > { %s1412_s28 = scalar_select %p1398_p12, %s1303_s11, %s26_s25  }
  0x26   : > { %p2323_p1 = scmp.eq.s32.totalorder %s1358_s13, 1  ;;  %p1140_p0 = scmp.lt.s32.totalorder %s1307_s12, 2 }
  0x27   : > { %2322 = sst [smem:[#allocation17_spill]] %s1412_s28  ;;  %s121_s30 = sand.u32 1, %s1303_s11  }
  0x28   : > { %p1420_p9 = por %p2323_p1, %p33_p13  ;;  %p35_p3 = por %p34_p2, %p33_p13 }
  0x29   : > { %s1053_s3 = sshll.u32 %s121_s30, 3  ;;  %s1117_s4 = sshll.u32 %s1307_s12, 7 }
  0x2a   : > { %s2324_s29 = scalar_select %p1420_p9, 1, 0 }
  0x2b   : > { %s2326_s0 = sld [smem:[#allocation32_spill]]  ;;  %s125_s8 = scalar_lea.vmem [#allocation2], %s1053_s3 }
  0x2c   : > { %2325 = sst [smem:[#allocation18_spill]] %s2324_s29  ;;  %s133_s14 = sshll.u32 %s125_s8, 4  ;;  %s134_s14 = int_to_ptr.vmem [resolvable:$true] %s133_s14 }
  0x2d   : > { %p1435_p11 = pnand %p1140_p0, %p35_p3  ;;  %s122_s18 = scalar_lea.sflag [#allocation3], %s121_s30 }
  0x2f   : > { %p1213_p13 = pneg %p1435_p11 }
  0x31   : > { %s1433_s7 = scalar_lea.hbm %s2326_s0, %s1117_s4  ;;  %s1216_s24 = scalar_lea.hbm %s2326_s0, 256 }
  0x32   : > { %s1211_s19 = scalar_lea.hbm %s1433_s7, 128  ;;  %p1217_p10 = scmp.lt.s32.totalorder %s1433_s7, %s2326_s0 }
  0x33   : > { %p1212_p12 = scmp.ne.s32.totalorder %s1433_s7, %s1211_s19  ;;  %p1218_p2 = scmp.lt.s32.totalorder %s1216_s24, %s1211_s19 }
  0x35   : > { %p1214_p5 = pnand %p1213_p13, %p1212_p12  ;;  %p1219_p1 = por %p1218_p2, %p1217_p10 }
  0x37   : > { %p1215_p7 = pneg %p1214_p5 }
  0x39   : > { %p1220_p0 = pnand %p1219_p1, %p1215_p7 }
  0x3b   : > { %1223 = shalt.err (!%p1220_p0)
}
  0x3c   : > { %s1224_s27 = scalar_lea.vmem %s134_s14, 128  ;;  %s1310_s30 = smov [#allocation2]  }
  0x3d   : > { %p1225_p3 = scmp.ne.s32.totalorder %s134_s14, %s1224_s27  ;;  %s1229_s3 = sshll.u32 %s1310_s30, 4  ;;  %s1230_s3 = int_to_ptr.vmem [resolvable:$false] %s1229_s3 }
  0x3e   : > { %s1231_s4 = scalar_lea.vmem %s1230_s3, 256  ;;  %p1232_p12 = scmp.lt.s32.totalorder %s134_s14, %s1230_s3 }
  0x3f   : > { %p1227_p6 = pnand %p1225_p3, %p1213_p13  ;;  %p1233_p5 = scmp.lt.s32.totalorder %s1231_s4, %s1224_s27 }
  0x41   : > { %p1228_p9 = pneg %p1227_p6  ;;  %p1234_p4 = por %p1233_p5, %p1232_p12 }
  0x43   : > { %p1235_p8 = pnand %p1234_p4, %p1228_p9 }
  0x45   : > { %1238 = shalt.err (!%p1235_p8)
}
  0x46   : > { %1134 = dma.hbm_to_vmem [thread:$0]  (!%p1435_p11), %s1433_s7, 128, %s134_s14, %s122_s18  }
  0x47   : > { %p2328_p7 = scmp.ne.s32.totalorder %s2318_s20, 0 }
  0x49   : > { %142 = sbr.rel (%p2328_p7) target bundleno = 719 (0x2cf), region = 28 }
  0x4e   : > { %s1456_s5 = sand.u32 1, %s1299_s10   ;;  %p2329_p4 = scmp.ne.s32.totalorder %s2314_s15, 0 }
  0x4f   : > { %s2281_s6 = sshll.u32 %s1456_s5, 3  ;;  %s145_s8 = scalar_lea.sflag [#allocation3], %s1456_s5 }
  0x50   : > { %s1462_s19 = scalar_lea.vmem [#allocation2], %s2281_s6 }
  0x51   : > { %1282 = dma.done.wait (%p2329_p4), %s145_s8, 128  }
  0x52   : > { %1284 = vsyncadd (%p2329_p4), %s145_s8, 4294967168  ;;  %p2330_p6 = scmp.eq.s32.totalorder %s1358_s13, 0 }
  0x54   : > { %1286 = dma.done.wait (%p2330_p6), [#allocation5], 16   ;;  %p2331_p8 = pmov %p2330_p6 }
  0x56   : > { %1288 = vsyncadd (%p2331_p8), [#allocation5], 4294967280 }
  0x57   : > { %157 = sfence }
  0x58   : > { %v174_v0 = vld [vmem:[%s1462_s19] sm:$0xff]  ;;  %vm178_vm0 = vcmask 1043456   ;;  %s1311_s15 = smov 2   ;;  %vm242_vm1 = vcmask 15360   ;;  %s1312_s20 = smov 127   ;;  %vm289_vm5 = vcmask 1039360  }
  0x59   : > { %v179_v1 = vsel %vm178_vm0, %v174_v0, -inf  ;;  %v193_v2 = vsel %vm178_vm0, %v174_v0, 0.0  ;;  %v176_v3 = vcombine.high %v174_v0, %v174_v0  ;;  %s1313_s7 = smov 125   ;;  %s1074_s14 = sld [smem:[#allocation6 + $0x7]]  ;;  %vm324_vm6 = vcmask 1022976  }
  0x5a   : > { %v180_v4 = vrot.slane %v179_v1, 4  ;;  %v194_v5 = vrot.slane %v193_v2, 4  ;;  %s1314_s17 = smov 124   ;;  %s1084_s18 = sld [smem:[#allocation6 + $0xc]]  ;;  %vm357_vm9 = vcmask 1014784   ;;  %vm412_vm11 = vcmask 1031168  }
  0x5b   : > { %v186_v6 = vsel %vm178_vm0, %v176_v3, -inf  ;;  %v200_v7 = vsel %vm178_vm0, %v176_v3, 0.0  ;;  %s1094_s22 = sld [smem:[#allocation6 + $0x11]]  ;;  %s1315_s23 = smov 126   ;;  %vm471_vm14 = vcmask 261120   ;;  %vm583_vm15 = vcmask 916480  }
  0x5c   : > { %v181_v8 = vmax.f32 %v179_v1, %v180_v4  ;;  %v195_v9 = vadd.f32 %v194_v5, %v193_v2  ;;  %v187_v10 = vrot.slane %v186_v6, 4  ;;  %v201_v11 = vrot.slane %v200_v7, 4  ;;  %s1104_s24 = sld [smem:[#allocation6 + $0x16]] }
  0x5d   : > { %s1075_s25 = sld [smem:[#allocation6 + $0x20]]  ;;  %vm695_vm0 = vcmask 785408  }
  0x5e   : > { %v182_v12 = vrot.slane %v181_v8, 2  ;;  %v196_v13 = vrot.slane %v195_v9, 2  ;;  %v188_v14 = vmax.f32 %v186_v6, %v187_v10  ;;  %v202_v15 = vadd.f32 %v201_v11, %v200_v7  ;;  %s1085_s26 = sld [smem:[#allocation6 + $0x25]] }
  0x5f   : > { %v499_v39 = vstv %s1074_s14  ;;  %s1095_s27 = sld [smem:[#allocation6 + $0x2a]] }
  0x60   : > { %v183_v16 = vmax.f32 %v181_v8, %v182_v12  ;;  %v197_v17 = vadd.f32 %v196_v13, %v195_v9  ;;  %v189_v18 = vrot.slane %v188_v14, 2  ;;  %v203_v19 = vrot.slane %v202_v15, 2  ;;  %s1105_s30 = sld [smem:[#allocation6 + $0x2f]] }
  0x61   : > { %v611_v41 = vstv %s1084_s18  ;;  %v723_v45 = vstv %s1094_s22  ;;  %s1064_s3 = sld [smem:[#allocation6 + $0x2]] }
  0x62   : > { %v184_v20 = vrot.slane %v183_v16, 1  ;;  %v198_v21 = vrot.slane %v197_v17, 1  ;;  %v190_v22 = vmax.f32 %v188_v14, %v189_v18  ;;  %v204_v23 = vadd.f32 %v203_v19, %v202_v15  ;;  %s1065_s4 = sld [smem:[#allocation6 + $0x1b]] }
  0x63   : > { %v835_v47 = vstv %s1104_s24  ;;  %v519_v50 = vstv %s1075_s25  ;;  %s1593_s8 = sld [smem:[#allocation6 + $0x5]] }
  0x64   : > { %v185_v24 = vmax.f32 %v183_v16, %v184_v20  ;;  %v199_v25 = vadd.f32 %v198_v21, %v197_v17  ;;  %v191_v26 = vrot.slane %v190_v22, 1  ;;  %v205_v27 = vrot.slane %v204_v23, 1  ;;  %s1605_s14 = sld [smem:[#allocation6]] }
  0x65   : > { %v631_v55 = vstv %s1085_s26  ;;  %v743_v59 = vstv %s1095_s27  ;;  %s1613_s18 = sld [smem:[#allocation6 + $0x23]] }
  0x66   : > { %238 = vrot.lane.b32.xlu0 %v185_v24, %s1311_s15  ;;  %v207_v28 = vmul.f32 0.25, %v199_v25  ;;  %v192_v29 = vmax.f32 %v190_v22, %v191_v26  ;;  %v206_v30 = vadd.f32 %v205_v27, %v204_v23  ;;  %v855_v0 = vstv %s1105_s30  ;;  %s1615_s22 = sld [smem:[#allocation6 + $0x28]] }
  0x67   : > { %v399_v9 = vstv %s1064_s3  ;;  %v2292_v25 = vlaneseq  ;;  %s1623_s24 = sld [smem:[#allocation6 + $0x19]] }
  0x68   : > { %251 = vrot.lane.b32.xlu1 %v207_v28, %s1311_s15  ;;  %v208_v31 = vmul.f32 0.25, %v206_v30  ;;  %v420_v14 = vstv %s1065_s4  ;;  %s1625_s25 = sld [smem:[#allocation6 + $0x6]] }
  0x69   : > { %v210_v28 = vand.u32 127, %v2292_v25  ;;  %s1628_s26 = sld [smem:[#allocation6 + $0xb]] }
  0x6a   : > { %240 = vrot.lane.b32.xlu0 %v192_v29, %s1311_s15  ;;  %s1630_s27 = sld [smem:[#allocation6 + $0x10]] }
  0x6b   : > { %v211_v29 = vadd.s32 128, %v210_v28  ;;  %s1636_s30 = sld [smem:[#allocation6 + $0x15]] }
  0x6c   : > { %253 = vrot.lane.b32.xlu1 %v208_v31, %s1311_s15  ;;  %s1599_s15 = sld [smem:[#allocation6 + $0xa]] }
  0x6d   : > { %s1638_s3 = sld [smem:[#allocation6 + $0x8]] }
  0x6e   : > { %s1640_s4 = sld [smem:[#allocation6 + $0xd]] }
  0x6f   : > { %s1642_s6 = sld [smem:[#allocation6 + $0x1]] }
  0x70   : > { %s1648_s0 = sld [smem:[#allocation6 + $0x12]] }
  0x71   : > { %s1650_s1 = sld [smem:[#allocation6 + $0x17]] }
  0x72   : > { %s1652_s28 = sld [smem:[#allocation6 + $0x3]] }
  0x73   : > { %s1654_s11 = sld [smem:[#allocation6 + $0x9]] }
  0x74   : > { %s1660_s10 = sld [smem:[#allocation6 + $0xe]] }
  0x75   : > { %s1662_s21 = sld [smem:[#allocation6 + $0x13]] }
  0x76   : > { %s1664_s12 = sld [smem:[#allocation6 + $0x18]] }
  0x77   : > { %s1668_s16 = sld [smem:[#allocation6 + $0x1f]] }
  0x78   : > { %s1677_s9 = sld [smem:[#allocation6 + $0x24]] }
  0x79   : > { %s1682_s2 = sld [smem:[#allocation6 + $0x29]] }
  0x7a   : > { %s1783_s29 = sld [smem:[#allocation6 + $0x31]] }
  0xd8   : > { %v239_v32 = vpop.permute.xlu0 %238 }
  0xd9   : > { %v1474_v33 = vsel %vm242_vm1, 0.0, %v239_v32 }
  0xda   : > { %283 = vrot.lane.b32.xlu0 %v1474_v33, %s1312_s20  ;;  %v252_v36 = vpop.permute.xlu1 %251  ;;  %v500_v40 = vmul.f32 %v499_v39, %v1474_v33  ;;  %v612_v44 = vmul.f32 %v611_v41, %v1474_v33  ;;  %v724_v46 = vmul.f32 %v723_v45, %v1474_v33  ;;  %v836_v48 = vmul.f32 %v835_v47, %v1474_v33 }
  0xdb   : > { %v1486_v37 = vsel %vm242_vm1, 0.0, %v252_v36  ;;  %v400_v10 = vmul.f32 %v399_v9, %v1474_v33 }
  0xdc   : > { %v241_v34 = vpop.permute.xlu0 %240  ;;  %v520_v51 = vmul.f32 %v519_v50, %v1486_v37  ;;  %v632_v56 = vmul.f32 %v631_v55, %v1486_v37  ;;  %v744_v61 = vmul.f32 %v743_v59, %v1486_v37  ;;  %v856_v2 = vmul.f32 %v855_v0, %v1486_v37 }
  0xdd   : > { %v1479_v35 = vsel %vm242_vm1, %v239_v32, %v241_v34  ;;  %v1493_v38 = vsel %vm242_vm1, %v241_v34, 0.0  ;;  %v421_v16 = vmul.f32 %v420_v14, %v1486_v37  ;;  %v216_v32 = vand.u32 15, %v210_v28 }
  0xde   : > { %318 = vrot.lane.b32.xlu0 %v1474_v33, %s1313_s7  ;;  %285 = vrot.lane.b32.xlu1 %v1479_v35, %s1312_s20  ;;  %v254_v42 = vpop.permute.xlu1 %253  ;;  %v501_v49 = vmul.f32 %v499_v39, %v1479_v35  ;;  %v502_v53 = vmul.f32 %v499_v39, %v1493_v38  ;;  %v613_v54 = vmul.f32 %v611_v41, %v1479_v35  ;;  %v223_v34 = vand.u32 15, %v211_v29 }
  0xdf   : > { %v1512_v43 = vsel %vm242_vm1, %v254_v42, 0.0  ;;  %v1528_v52 = vsel %vm242_vm1, %v252_v36, %v254_v42  ;;  %v614_v57 = vmul.f32 %v611_v41, %v1493_v38  ;;  %v725_v58 = vmul.f32 %v723_v45, %v1479_v35 }
  0xe0   : > { %v726_v60 = vmul.f32 %v723_v45, %v1493_v38  ;;  %v838_v62 = vmul.f32 %v835_v47, %v1493_v38  ;;  %v837_v63 = vmul.f32 %v835_v47, %v1479_v35  ;;  %v521_v1 = vmul.f32 %v519_v50, %v1528_v52 }
  0xe1   : > { %v633_v3 = vmul.f32 %v631_v55, %v1528_v52  ;;  %v522_v4 = vmul.f32 %v519_v50, %v1512_v43  ;;  %v745_v5 = vmul.f32 %v743_v59, %v1528_v52  ;;  %v634_v6 = vmul.f32 %v631_v55, %v1512_v43 }
  0xe2   : > { %351 = vrot.lane.b32.xlu0 %v1474_v33, %s1314_s17  ;;  %298 = vrot.lane.b32.xlu1 %v1486_v37, %s1312_s20  ;;  %v857_v7 = vmul.f32 %v855_v0, %v1528_v52  ;;  %v746_v8 = vmul.f32 %v743_v59, %v1512_v43  ;;  %v858_v11 = vmul.f32 %v855_v0, %v1512_v43  ;;  %v261_v39 = vadd.s32 4294967294, %v216_v32 }
  0xe3   : > { %v402_v12 = vmul.f32 %v399_v9, %v1493_v38  ;;  %v401_v13 = vmul.f32 %v399_v9, %v1479_v35  ;;  %v422_v15 = vmul.f32 %v420_v14, %v1528_v52  ;;  %v423_v17 = vmul.f32 %v420_v14, %v1512_v43 }
  0xe4   : > { %v262_v42 = vadd.s32 4294967294, %v223_v34  ;;  %vm263_vm2 = vcmp.ge.s32.totalorder %v261_v39, 0  ;;  %v591_v47 = vstv %s1599_s15  ;;  %s1698_s15 = sld [smem:[#allocation6 + $0x21]]  ;;  %v2297_v9 = vstv %s1630_s27 }
  0xe5   : > { %v269_v55 = vsel %vm263_vm2, %v1474_v33, 0.0  ;;  %v1703_v33 = vadd.s32 1, %v223_v34  ;;  %v2298_v39 = vstv %s1642_s6  ;;  %vm807_vm1 = vcmask 654336  }
  0xe6   : > { %287 = vrot.lane.b32.xlu0 %v1493_v38, %s1312_s20  ;;  %320 = vrot.lane.b32.xlu1 %v1479_v35, %s1313_s7  ;;  %vm264_vm3 = vcmp.ge.s32.totalorder %v262_v42, 0 }
  0xe7   : > { %vm315_vm10 = vcmp.lt.s32.totalorder %v1703_v33, 16 }
  0xea   : > { %322 = vrot.lane.b32.xlu0 %v1493_v38, %s1313_s7  ;;  %331 = vrot.lane.b32.xlu1 %v1486_v37, %s1313_s7 }
  0xee   : > { %506 = vrot.lane.b32.xlu0 %v500_v40, %s1315_s23  ;;  %353 = vrot.lane.b32.xlu1 %v1479_v35, %s1314_s17 }
  0xf2   : > { %355 = vrot.lane.b32.xlu0 %v1493_v38, %s1314_s17  ;;  %364 = vrot.lane.b32.xlu1 %v1486_v37, %s1314_s17 }
  0xf6   : > { %618 = vrot.lane.b32.xlu0 %v612_v44, %s1315_s23  ;;  %302 = vrot.lane.b32.xlu1 %v1512_v43, %s1312_s20 }
  0xfa   : > { %730 = vrot.lane.b32.xlu0 %v724_v46, %s1315_s23  ;;  %335 = vrot.lane.b32.xlu1 %v1512_v43, %s1313_s7  ;;  %v479_v46 = vstv %s1593_s8  ;;  %s1691_s8 = sld [smem:[#allocation6 + $0x2e]] }
  0xfe   : > { %842 = vrot.lane.b32.xlu0 %v836_v48, %s1315_s23  ;;  %508 = vrot.lane.b32.xlu1 %v501_v49, %s1315_s23 }
 0x102   : > { %300 = vrot.lane.b32.xlu0 %v1528_v52, %s1312_s20  ;;  %526 = vrot.lane.b32.xlu1 %v520_v51, %s1315_s23  ;;  %s1601_s20 = sld [smem:[#allocation6 + $0xf]]  ;;  %v595_v51 = vstv %s1613_s18 }
 0x103   : > { %s1743_s18 = sld [smem:[#allocation6 + $0x22]] }
 0x106   : > { %333 = vrot.lane.b32.xlu0 %v1528_v52, %s1313_s7  ;;  %368 = vrot.lane.b32.xlu1 %v1512_v43, %s1314_s17  ;;  %s1603_s7 = sld [smem:[#allocation6 + $0x14]]  ;;  %v1666_v43 = vadd.s32 4294967295, %v216_v32 }
 0x108   : > { %v703_v48 = vstv %s1601_s20  ;;  %vm275_vm4 = vcmp.ge.s32.totalorder %v1666_v43, 0  ;;  %s1713_s20 = sld [smem:[#allocation6 + $0x26]]  ;;  %v2354_v43 = vstv %s1654_s11 }
 0x10a   : > { %510 = vrot.lane.b32.xlu0 %v502_v53, %s1315_s23  ;;  %620 = vrot.lane.b32.xlu1 %v613_v54, %s1315_s23  ;;  %v2293_v53 = vstv %s1605_s14  ;;  %v1685_v54 = vadd.s32 4294967295, %v223_v34 }
 0x10c   : > { %v815_v49 = vstv %s1603_s7  ;;  %s1721_s7 = sld [smem:[#allocation6 + $0x2b]]  ;;  %vm276_vm7 = vcmp.ge.s32.totalorder %v1685_v54, 0  ;;  %v2355_v54 = vstv %s1660_s10 }
 0x10e   : > { %366 = vrot.lane.b32.xlu0 %v1528_v52, %s1314_s17  ;;  %638 = vrot.lane.b32.xlu1 %v632_v56, %s1315_s23  ;;  %s1611_s17 = sld [smem:[#allocation6 + $0x1e]]  ;;  %v707_v56 = vstv %s1615_s22 }
 0x10f   : > { %s1759_s22 = sld [smem:[#allocation6 + $0x27]] }
 0x112   : > { %622 = vrot.lane.b32.xlu0 %v614_v57, %s1315_s23  ;;  %732 = vrot.lane.b32.xlu1 %v725_v58, %s1315_s23  ;;  %v1696_v58 = vsel %vm264_vm3, %v1479_v35, 0.0  ;;  %v1715_v35 = vmul.f32 %v479_v46, %v269_v55 }
 0x113   : > { %2332 = vst [vmem:[#allocation19_spill] sm:$0xff] %v1696_v58  ;;  %v1754_v14 = vmul.f32 %v703_v48, %v1696_v58  ;;  %v1766_v28 = vmul.f32 %v815_v49, %v1696_v58 }
 0x114   : > { %v483_v50 = vstv %s1611_s17  ;;  %s1733_s17 = sld [smem:[#allocation6 + $0x30]] }
 0x116   : > { %734 = vrot.lane.b32.xlu0 %v726_v60, %s1315_s23  ;;  %750 = vrot.lane.b32.xlu1 %v744_v61, %s1315_s23  ;;  %v1701_v60 = vadd.s32 1, %v216_v32  ;;  %v1705_v61 = vadd.s32 2, %v216_v32 }
 0x118   : > { %vm314_vm8 = vcmp.lt.s32.totalorder %v1701_v60, 16  ;;  %vm347_vm12 = vcmp.lt.s32.totalorder %v1705_v61, 16 }
 0x11a   : > { %846 = vrot.lane.b32.xlu0 %v838_v62, %s1315_s23  ;;  %844 = vrot.lane.b32.xlu1 %v837_v63, %s1315_s23  ;;  %v1707_v62 = vadd.s32 2, %v223_v34 }
 0x11c   : > { %vm348_vm13 = vcmp.lt.s32.totalorder %v1707_v62, 16 }
 0x11e   : > { %528 = vrot.lane.b32.xlu0 %v521_v1, %s1315_s23  ;;  %862 = vrot.lane.b32.xlu1 %v856_v2, %s1315_s23  ;;  %v2295_v1 = vstv %s1625_s25 }
 0x122   : > { %640 = vrot.lane.b32.xlu0 %v633_v3, %s1315_s23  ;;  %530 = vrot.lane.b32.xlu1 %v522_v4, %s1315_s23  ;;  %v1719_v3 = vmul.f32 %v591_v47, %v269_v55  ;;  %v2294_v4 = vstv %s1628_s26 }
 0x126   : > { %752 = vrot.lane.b32.xlu0 %v745_v5, %s1315_s23  ;;  %642 = vrot.lane.b32.xlu1 %v634_v6, %s1315_s23  ;;  %v1727_v6 = vmul.f32 %v479_v46, %v1696_v58 }
 0x12a   : > { %864 = vrot.lane.b32.xlu0 %v857_v7, %s1315_s23  ;;  %754 = vrot.lane.b32.xlu1 %v746_v8, %s1315_s23  ;;  %v1731_v7 = vsel %vm263_vm2, %v1486_v37, 0.0  ;;  %v1735_v8 = vmul.f32 %v703_v48, %v269_v55  ;;  %vm919_vm2 = vcmask 523264  }
 0x12b   : > { %2333 = vst [vmem:[#allocation20_spill] sm:$0xff] %v1731_v7  ;;  %v1769_v29 = vmul.f32 %v483_v50, %v1731_v7  ;;  %v1777_v34 = vmul.f32 %v595_v51, %v1731_v7  ;;  %v1787_v42 = vmul.f32 %v707_v56, %v1731_v7 }
 0x12e   : > { %406 = vrot.lane.b32.xlu0 %v400_v10, %s1315_s23  ;;  %866 = vrot.lane.b32.xlu1 %v858_v11, %s1315_s23  ;;  %v1741_v11 = vsel %vm264_vm3, %v1528_v52, 0.0 }
 0x12f   : > { %2334 = vst [vmem:[#allocation21_spill] sm:$0xff] %v1741_v11  ;;  %v1774_v32 = vmul.f32 %v483_v50, %v1741_v11  ;;  %v1790_v46 = vmul.f32 %v707_v56, %v1741_v11  ;;  %v1806_v56 = vmul.f32 %v2293_v53, %v269_v55 }
 0x131   : > { %2335 = vst [vmem:[#allocation22_spill] sm:$0xff] %v1806_v56 }
 0x132   : > { %410 = vrot.lane.b32.xlu0 %v402_v12, %s1315_s23  ;;  %408 = vrot.lane.b32.xlu1 %v401_v13, %s1315_s23  ;;  %v1751_v13 = vmul.f32 %v591_v47, %v1696_v58 }
 0x136   : > { %429 = vrot.lane.b32.xlu0 %v422_v15, %s1315_s23  ;;  %427 = vrot.lane.b32.xlu1 %v421_v16, %s1315_s23  ;;  %v1756_v15 = vmul.f32 %v815_v49, %v269_v55  ;;  %v823_v16 = vstv %s1636_s30  ;;  %s2410_s30 = sld [smem:[#allocation34_spill]] }
 0x13a   : > { %431 = vrot.lane.b32.xlu1 %v423_v17, %s1315_s23  ;;  %s1617_s23 = sld [smem:[#allocation6 + $0x2d]] }
 0x140   : > { %v819_v57 = vstv %s1617_s23  ;;  %s1771_s23 = sld [smem:[#allocation6 + $0x2c]] }
 0x141   : > { %v1793_v47 = vmul.f32 %v819_v57, %v1731_v7 }
 0x14c   : > { %v1587_v18 = vpop.permute.xlu0 %283 }
 0x150   : > { %v1589_v19 = vpop.permute.xlu1 %285  ;;  %v1591_v20 = vpop.permute.xlu0 %318 }
 0x151   : > { %v290_v52 = vsel %vm289_vm5, %v1587_v18, %v1589_v19  ;;  %v1780_v18 = vmul.f32 %v595_v51, %v1741_v11  ;;  %v1802_v51 = vmul.f32 %v819_v57, %v1741_v11 }
 0x152   : > { %v294_v48 = vsel %vm275_vm4, %v290_v52, 0.0 }
 0x153   : > { %v488_v25 = vmul.f32 %v2295_v1, %v294_v48  ;;  %v600_v53 = vmul.f32 %v2294_v4, %v294_v48  ;;  %v712_v55 = vmul.f32 %v2297_v9, %v294_v48  ;;  %v824_v4 = vmul.f32 %v823_v16, %v294_v48 }
 0x154   : > { %v1595_v21 = vpop.permute.xlu1 %298  ;;  %v1597_v22 = vpop.permute.xlu0 %351  ;;  %v1848_v11 = vmul.f32 %v2298_v39, %v294_v48  ;;  %v2339_v39 = vstv %s1625_s25 }
 0x155   : > { %v490_v10 = vadd.f32 %v488_v25, %v1715_v35  ;;  %v1871_v17 = vadd.f32 %v712_v55, %v1735_v8  ;;  %v1883_v35 = vadd.f32 %v824_v4, %v1756_v15 }
 0x156   : > { %2337 = vst [vmem:[#allocation24_spill] sm:$0xff] %v1848_v11 }
 0x158   : > { %v1607_v23 = vpop.permute.xlu1 %320  ;;  %v1609_v24 = vpop.permute.xlu0 %287 }
 0x159   : > { %v291_v5 = vsel %vm289_vm5, %v1589_v19, %v1609_v24  ;;  %v325_v19 = vsel %vm324_vm6, %v1591_v20, %v1607_v23  ;;  %v602_v20 = vadd.f32 %v600_v53, %v1719_v3  ;;  %v2341_v53 = vstv %s1630_s27 }
 0x15a   : > { %v1838_v59 = vsel %vm276_vm7, %v291_v5, 0.0  ;;  %v1853_v52 = vsel %vm314_vm8, %v325_v19, 0.0 }
 0x15b   : > { %2336 = vst [vmem:[#allocation23_spill] sm:$0xff] %v1838_v59  ;;  %2338 = vst [vmem:[#allocation25_spill] sm:$0xff] %v1853_v52  ;;  %v489_v9 = vmul.f32 %v2339_v39, %v1838_v59  ;;  %v825_v3 = vmul.f32 %v823_v16, %v1838_v59  ;;  %v2343_v39 = vstv %s1638_s3 }
 0x15c   : > { %v1619_v26 = vpop.permute.xlu1 %331  ;;  %v1621_v27 = vpop.permute.xlu0 %322  ;;  %v540_v55 = vmul.f32 %v2343_v39, %v1853_v52 }
 0x15d   : > { %v326_v5 = vsel %vm324_vm6, %v1607_v23, %v1621_v27  ;;  %v2340_v23 = vstv %s1628_s26 }
 0x15e   : > { %v601_v27 = vmul.f32 %v2340_v23, %v1838_v59  ;;  %v1890_v8 = vsel %vm315_vm10, %v326_v5, 0.0 }
 0x15f   : > { %2342 = vst [vmem:[#allocation26_spill] sm:$0xff] %v1890_v8 }
 0x160   : > { %v1632_v30 = vpop.permute.xlu1 %353  ;;  %v1634_v31 = vpop.permute.xlu0 %506 }
 0x161   : > { %v358_v25 = vsel %vm357_vm9, %v1597_v22, %v1632_v30  ;;  %v2344_v22 = vstv %s1640_s4 }
 0x162   : > { %v1898_v23 = vmul.f32 %v2344_v22, %v1853_v52  ;;  %v1916_v22 = vsel %vm347_vm12, %v358_v25, 0.0  ;;  %v2349_v25 = vstv %s1640_s4  ;;  %s953_s4 = scalar_lea.sflag [#allocation4], %s1456_s5 }
 0x163   : > { %2346 = vst [vmem:[#allocation27_spill] sm:$0xff] %v1916_v22  ;;  %v1935_v57 = vmul.f32 %v2349_v25, %v1890_v8 }
 0x164   : > { %v1644_v36 = vpop.permute.xlu1 %364  ;;  %v1646_v38 = vpop.permute.xlu0 %355 }
 0x165   : > { %v359_v15 = vsel %vm357_vm9, %v1632_v30, %v1646_v38  ;;  %v1922_v38 = vadd.f32 %v601_v27, %v1751_v13 }
 0x166   : > { %v1945_v13 = vsel %vm348_vm13, %v359_v15, 0.0 }
 0x167   : > { %2350 = vst [vmem:[#allocation28_spill] sm:$0xff] %v1945_v13 }
 0x168   : > { %v1656_v40 = vpop.permute.xlu1 %302  ;;  %v1658_v41 = vpop.permute.xlu0 %618 }
 0x16c   : > { %v1670_v44 = vpop.permute.xlu1 %335  ;;  %v1672_v45 = vpop.permute.xlu0 %730 }
 0x170   : > { %v1709_v63 = vpop.permute.xlu1 %508  ;;  %v1711_v0 = vpop.permute.xlu0 %842 }
 0x171   : > { %v512_v48 = vsel %vm412_vm11, %v1634_v31, %v1709_v63  ;;  %v713_v31 = vmul.f32 %v2341_v53, %v1838_v59  ;;  %v2345_v53 = vstv %s1648_s0 }
 0x172   : > { %v1903_v4 = vmul.f32 %v2345_v53, %v1853_v52  ;;  %v516_v16 = vadd.f32 %v512_v48, %v490_v10  ;;  %v491_v53 = vadd.f32 %v489_v9, %v1727_v6  ;;  %v1941_v9 = vadd.f32 %v825_v3, %v1766_v28 }
 0x173   : > { %v1938_v6 = vadd.f32 %v713_v31, %v1754_v14  ;;  %v2351_v14 = vstv %s1648_s0  ;;  %v2352_v3 = vstv %s1650_s1  ;;  %s2115_s0 = sld [smem:[#allocation6 + $0x1a]] }
 0x174   : > { %v1746_v12 = vpop.permute.xlu1 %526  ;;  %v1748_v37 = vpop.permute.xlu0 %300  ;;  %v1958_v31 = vmul.f32 %v2351_v14, %v1890_v8  ;;  %v542_v28 = vadd.f32 %v540_v55, %v516_v16  ;;  %v1963_v15 = vmul.f32 %v2352_v3, %v1890_v8  ;;  %v2356_v14 = vstv %s1662_s21 }
 0x175   : > { %v304_v5 = vsel %vm289_vm5, %v1595_v21, %v1748_v37  ;;  %v305_v39 = vsel %vm289_vm5, %v1748_v37, %v1656_v40  ;;  %v2347_v21 = vstv %s1650_s1  ;;  %v2348_v40 = vstv %s1638_s3  ;;  %s1316_s1 = smov 32  }
 0x176   : > { %v1927_v48 = vmul.f32 %v2347_v21, %v1853_v52  ;;  %v541_v37 = vmul.f32 %v2348_v40, %v1890_v8  ;;  %v1949_v27 = vsel %vm275_vm4, %v304_v5, 0.0  ;;  %v1953_v21 = vsel %vm276_vm7, %v305_v39, 0.0  ;;  %2353 = vst [vmem:[#allocation29_spill] sm:$0xff] %v1963_v15 }
 0x177   : > { %v552_v5 = vmul.f32 %v2354_v43, %v1916_v22  ;;  %v1971_v40 = vmul.f32 %v2355_v54, %v1916_v22  ;;  %v1983_v3 = vmul.f32 %v2356_v14, %v1916_v22  ;;  %v2357_v43 = vstv %s1664_s12 }
 0x178   : > { %v1797_v49 = vpop.permute.xlu1 %368  ;;  %v1799_v50 = vpop.permute.xlu0 %333  ;;  %v1988_v8 = vmul.f32 %v2357_v43, %v1916_v22  ;;  %v2359_v54 = vstv %s1668_s16  ;;  %v2361_v14 = vstv %s1654_s11  ;;  %v2362_v22 = vstv %s1677_s9  ;;  %s2160_s9 = sld [smem:[#allocation6 + $0x4]]  ;;  %s1317_s11 = smov 112  }
 0x179   : > { %v337_v39 = vsel %vm324_vm6, %v1619_v26, %v1799_v50  ;;  %v338_v26 = vsel %vm324_vm6, %v1799_v50, %v1670_v44  ;;  %v553_v7 = vmul.f32 %v2361_v14, %v1945_v13  ;;  %v606_v58 = vmul.f32 %v2362_v22, %v1949_v27  ;;  %s1319_s16 = smov 80  }
 0x17a   : > { %2358 = vst [vmem:[#allocation30_spill] sm:$0xff] %v1988_v8  ;;  %v2363_v44 = vmov %v2362_v22  ;;  %v554_v11 = vadd.f32 %v552_v5, %v542_v28  ;;  %v2027_v22 = vsel %vm315_vm10, %v338_v26, 0.0  ;;  %v2367_v8 = vstv %s1682_s2  ;;  %s2153_s2 = sld [smem:[#allocation6 + $0x1c]] }
 0x17b   : > { %v607_v50 = vmul.f32 %v2363_v44, %v1953_v21  ;;  %v718_v60 = vmul.f32 %v2367_v8, %v1949_v27 }
 0x17c   : > { %v1830_v24 = vpop.permute.xlu1 %620  ;;  %v511_v2 = vpop.permute.xlu0 %510 }
 0x17d   : > { %v513_v55 = vsel %vm412_vm11, %v1709_v63, %v511_v2  ;;  %v494_v63 = vmul.f32 %v2359_v54, %v1949_v27  ;;  %v2360_v2 = vmov %v2359_v54  ;;  %v624_v43 = vsel %vm412_vm11, %v1658_v41, %v1830_v24 }
 0x17e   : > { %v495_v52 = vmul.f32 %v2360_v2, %v1953_v21  ;;  %v2364_v54 = vstv %s1660_s10  ;;  %v2018_v2 = vsel %vm314_vm8, %v337_v39, 0.0  ;;  %v517_v14 = vadd.f32 %v513_v55, %v491_v53  ;;  %s2165_s10 = sld [smem:[#allocation6 + $0x1d]] }
 0x17f   : > { %v2014_v59 = vmul.f32 %v2364_v54, %v1945_v13  ;;  %v2365_v41 = vstv %s1662_s21  ;;  %v2368_v39 = vmov %v2367_v8  ;;  %v2369_v53 = vstv %s1691_s8  ;;  %s1320_s21 = smov 64  }
 0x180   : > { %v1866_v1 = vpop.permute.xlu1 %638  ;;  %v1868_v19 = vpop.permute.xlu0 %366  ;;  %v2023_v56 = vmul.f32 %v2365_v41, %v1945_v13  ;;  %v719_v15 = vmul.f32 %v2368_v39, %v1953_v21  ;;  %v830_v28 = vmul.f32 %v2369_v53, %v1949_v27  ;;  %v628_v5 = vadd.f32 %v624_v43, %v602_v20 }
 0x181   : > { %v496_v55 = vadd.f32 %v494_v63, %v1769_v29  ;;  %v497_v33 = vadd.f32 %v495_v52, %v1774_v32  ;;  %v2370_v26 = vmov %v2369_v53  ;;  %v370_v8 = vsel %vm357_vm9, %v1644_v36, %v1868_v19 }
 0x182   : > { %2366 = vst [vmem:[#allocation31_spill] sm:$0xff] %v2023_v56  ;;  %v831_v41 = vmul.f32 %v2370_v26, %v1953_v21  ;;  %v2371_v13 = vstv %s1698_s15  ;;  %v608_v56 = vadd.f32 %v606_v58, %v1777_v34  ;;  %v609_v53 = vadd.f32 %v607_v50, %v1780_v18  ;;  %s1321_s15 = smov [#allocation7]  }
 0x183   : > { %v546_v39 = vmul.f32 %v2371_v13, %v2018_v2  ;;  %v543_v20 = vadd.f32 %v541_v37, %v517_v14  ;;  %v371_v29 = vsel %vm357_vm9, %v1868_v19, %v1797_v49  ;;  %v2372_v32 = vmov %v2371_v13 }
 0x184   : > { %v1919_v30 = vpop.permute.xlu1 %732  ;;  %v623_v10 = vpop.permute.xlu0 %622  ;;  %v547_v52 = vmul.f32 %v2372_v32, %v2027_v22  ;;  %v2373_v63 = vstv %s1713_s20  ;;  %v720_v37 = vadd.f32 %v718_v60, %v1787_v42  ;;  %v2375_v49 = vstv %s1721_s7 }
 0x185   : > { %v658_v43 = vmul.f32 %v2373_v63, %v2018_v2  ;;  %v625_v36 = vsel %vm412_vm11, %v1830_v24, %v623_v10  ;;  %v2374_v34 = vmov %v2373_v63  ;;  %v770_v19 = vmul.f32 %v2375_v49, %v2018_v2 }
 0x186   : > { %v659_v18 = vmul.f32 %v2374_v34, %v2027_v22  ;;  %v654_v50 = vadd.f32 %v1898_v23, %v628_v5  ;;  %v2074_v14 = vsel %vm347_vm12, %v370_v8, 0.0  ;;  %v721_v10 = vadd.f32 %v719_v15, %v1790_v46 }
 0x187   : > { %v2081_v26 = vsel %vm348_vm13, %v371_v29, 0.0  ;;  %v2376_v60 = vmov %v2375_v49  ;;  %v832_v61 = vadd.f32 %v830_v28, %v1793_v47  ;;  %v629_v23 = vadd.f32 %v625_v36, %v1922_v38 }
 0x188   : > { %v1978_v16 = vpop.permute.xlu1 %750  ;;  %v735_v25 = vpop.permute.xlu0 %734  ;;  %v2086_v32 = vmul.f32 %v2376_v60, %v2027_v22  ;;  %v2377_v5 = vstv %s1733_s17  ;;  %v2096_v46 = vadd.f32 %v831_v41, %v1802_v51  ;;  %v736_v62 = vsel %vm412_vm11, %v1672_v45, %v1919_v30 }
 0x189   : > { %v2093_v8 = vmul.f32 %v2377_v5, %v2018_v2  ;;  %v737_v15 = vsel %vm412_vm11, %v1919_v30, %v735_v25  ;;  %v2378_v38 = vstv %s1743_s18  ;;  %v666_v45 = vadd.f32 %v1971_v40, %v654_v50 }
 0x18a   : > { %v558_v29 = vmul.f32 %v2378_v38, %v2074_v14  ;;  %v2379_v51 = vmov %v2378_v38  ;;  %v740_v36 = vadd.f32 %v736_v62, %v1871_v17  ;;  %v2380_v34 = vstv %s1759_s22 }
 0x18b   : > { %v559_v41 = vmul.f32 %v2379_v51, %v2081_v26  ;;  %v670_v49 = vmul.f32 %v2380_v34, %v2074_v14 }
 0x18c   : > { %v845_v44 = vpop.permute.xlu1 %844  ;;  %v847_v54 = vpop.permute.xlu0 %846 }
 0x18d   : > { %v848_v30 = vsel %vm412_vm11, %v1711_v0, %v845_v44  ;;  %v849_v17 = vsel %vm412_vm11, %v845_v44, %v847_v54  ;;  %v2382_v44 = vstv %s1771_s23 }
 0x18e   : > { %v852_v60 = vadd.f32 %v848_v30, %v1883_v35  ;;  %v782_v54 = vmul.f32 %v2382_v44, %v2074_v14  ;;  %v2385_v30 = vstv %s1783_s29  ;;  %s2408_s29 = sld [smem:[#allocation18_spill]] }
 0x190   : > { %v2062_v13 = vpop.permute.xlu1 %862  ;;  %v529_v58 = vpop.permute.xlu0 %528 }
 0x191   : > { %v532_v24 = vsel %vm412_vm11, %v1746_v12, %v529_v58  ;;  %v555_v12 = vadd.f32 %v553_v7, %v543_v20 }
 0x192   : > { %v536_v42 = vadd.f32 %v532_v24, %v496_v55 }
 0x194   : > { %v548_v55 = vadd.f32 %v546_v39, %v536_v42  ;;  %v531_v47 = vpop.permute.xlu1 %530  ;;  %v641_v28 = vpop.permute.xlu0 %640  ;;  %p2411_p11 = scmp.ne.s32.totalorder %s2408_s29, 0 }
 0x195   : > { %v533_v63 = vsel %vm412_vm11, %v529_v58, %v531_v47  ;;  %v644_v7 = vsel %vm412_vm11, %v1866_v1, %v641_v28  ;;  %v655_v58 = vadd.f32 %v1935_v57, %v629_v23  ;;  %v741_v1 = vadd.f32 %v737_v15, %v1938_v6 }
 0x196   : > { %v537_v25 = vadd.f32 %v533_v63, %v497_v33  ;;  %v648_v39 = vadd.f32 %v644_v7, %v608_v56  ;;  %v560_v20 = vadd.f32 %v558_v29, %v548_v55  ;;  %v2381_v56 = vmov %v2380_v34  ;;  %v2388_v34 = vld [vmem:[#allocation30_spill] sm:$0xff] }
 0x197   : > { %v671_v33 = vmul.f32 %v2381_v56, %v2081_v26  ;;  %v767_v62 = vadd.f32 %v1958_v31, %v741_v1  ;;  %v667_v35 = vadd.f32 %v2014_v59, %v655_v58  ;;  %v2384_v7 = vmov %v2382_v44  ;;  %v2387_v58 = vld [vmem:[#allocation31_spill] sm:$0xff] }
 0x198   : > { %v549_v24 = vadd.f32 %v547_v52, %v537_v25  ;;  %v660_v42 = vadd.f32 %v658_v43, %v648_v39  ;;  %v643_v40 = vpop.permute.xlu1 %642  ;;  %v753_v50 = vpop.permute.xlu0 %752  ;;  %v562_v0 = vadd.f32 %v560_v20, %v554_v11  ;;  %v766_v11 = vadd.f32 %v1903_v4, %v740_v36  ;;  %v2396_v44 = vld [vmem:[#allocation19_spill] sm:$0xff] }
 0x199   : > { %v645_v57 = vsel %vm412_vm11, %v641_v28, %v643_v40  ;;  %v756_v6 = vsel %vm412_vm11, %v1978_v16, %v753_v50  ;;  %v878_v28 = vadd.f32 %v1927_v48, %v852_v60  ;;  %v853_v4 = vadd.f32 %v849_v17, %v1941_v9  ;;  %v2390_v40 = vld [vmem:[#allocation24_spill] sm:$0xff] }
 0x19a   : > { %v649_v23 = vadd.f32 %v645_v57, %v609_v53  ;;  %v760_v5 = vadd.f32 %v756_v6, %v720_v37  ;;  %566 = vrot.lane.b32.xlu0 %v562_v0, %s1316_s1  ;;  %v561_v52 = vadd.f32 %v559_v41, %v549_v24  ;;  %v672_v43 = vadd.f32 %v670_v49, %v660_v42  ;;  %v2389_v42 = vld [vmem:[#allocation22_spill] sm:$0xff]  ;;  %v2391_v0 = vld [vmem:[#allocation23_spill] sm:$0xff] }
 0x19b   : > { %v778_v48 = vadd.f32 %v1983_v3, %v766_v11  ;;  %v783_v51 = vmul.f32 %v2384_v7, %v2081_v26  ;;  %v894_v25 = vmul.f32 %v2385_v30, %v2074_v14  ;;  %v2386_v3 = vld [vmem:[#allocation29_spill] sm:$0xff]  ;;  %v779_v1 = vadd.f32 %v2387_v58, %v767_v62 }
 0x19c   : > { %v661_v15 = vadd.f32 %v659_v18, %v649_v23  ;;  %v772_v16 = vadd.f32 %v770_v19, %v760_v5  ;;  %v755_v53 = vpop.permute.xlu1 %754  ;;  %v865_v37 = vpop.permute.xlu0 %864  ;;  %v563_v55 = vadd.f32 %v561_v52, %v555_v12  ;;  %v674_v47 = vadd.f32 %v672_v43, %v666_v45 }
 0x19d   : > { %v757_v31 = vsel %vm412_vm11, %v753_v50, %v755_v53  ;;  %v868_v59 = vsel %vm412_vm11, %v2062_v13, %v865_v37  ;;  %v393_v19 = vstv %s2115_s0  ;;  %v2383_v12 = vstv %s1733_s17 }
 0x19e   : > { %v761_v38 = vadd.f32 %v757_v31, %v721_v10  ;;  %v872_v29 = vadd.f32 %v868_v59, %v832_v61  ;;  %568 = vrot.lane.b32.xlu1 %v563_v55, %s1316_s1  ;;  %678 = vrot.lane.b32.xlu0 %v674_v47, %s1316_s1  ;;  %v673_v18 = vadd.f32 %v671_v33, %v661_v15  ;;  %v2392_v56 = vstv %s1642_s6  ;;  %s1118_s6 = sshll.u32 %s1358_s13, 7  ;;  %s1243_s13 = sshll.u32 %s1321_s15, 4  ;;  %s1244_s13 = int_to_ptr.vmem [resolvable:$false] %s1243_s13 }
 0x19f   : > { %v883_v63 = vmul.f32 %v2383_v12, %v2027_v22  ;;  %v784_v9 = vadd.f32 %v782_v54, %v772_v16  ;;  %v879_v39 = vadd.f32 %v2386_v3, %v853_v4  ;;  %v890_v49 = vadd.f32 %v2388_v34, %v878_v28  ;;  %v2400_v28 = vld [vmem:[#allocation25_spill] sm:$0xff]  ;;  %s965_s3 = scalar_lea.hbm %s2410_s30, %s1118_s6  ;;  %s1245_s20 = scalar_lea.vmem %s1244_s13, 256 }
 0x1a0   : > { %v773_v13 = vadd.f32 %v2086_v32, %v761_v38  ;;  %v884_v10 = vadd.f32 %v2093_v8, %v872_v29  ;;  %v867_v61 = vpop.permute.xlu1 %866  ;;  %v407_v41 = vpop.permute.xlu0 %406  ;;  %v675_v45 = vadd.f32 %v673_v18, %v667_v35  ;;  %v390_v50 = vadd.f32 %v2390_v40, %v2389_v42 }
 0x1a1   : > { %v869_v20 = vsel %vm412_vm11, %v865_v37, %v867_v61  ;;  %v786_v36 = vadd.f32 %v784_v9, %v778_v48  ;;  %v389_v33 = vmul.f32 %v2392_v56, %v2391_v0  ;;  %v394_v60 = vmul.f32 %v393_v19, %v1949_v27  ;;  %v2398_v27 = vld [vmem:[#allocation20_spill] sm:$0xff] }
 0x1a2   : > { %v873_v32 = vadd.f32 %v869_v20, %v2096_v46  ;;  %680 = vrot.lane.b32.xlu1 %v675_v45, %s1316_s1  ;;  %v785_v8 = vadd.f32 %v783_v51, %v773_v13  ;;  %v896_v24 = vadd.f32 %v894_v25, %v884_v10  ;;  %v2393_v46 = vld [vmem:[#allocation28_spill] sm:$0xff]  ;;  %v2394_v17 = vstv %s1664_s12  ;;  %v2402_v51 = vld [vmem:[#allocation21_spill] sm:$0xff]  ;;  %s1318_s12 = smov 96  }
 0x1a3   : > { %790 = vrot.lane.b32.xlu0 %v786_v36, %s1316_s1  ;;  %v889_v57 = vmul.f32 %v2394_v17, %v2393_v46  ;;  %v2395_v11 = vmov %v2385_v30  ;;  %v2397_v54 = vstv %s1605_s14  ;;  %v2399_v53 = vstv %s1623_s24  ;;  %s2409_s14 = sshll.u32 %s1456_s5, 3 }
 0x1a4   : > { %v885_v6 = vadd.f32 %v883_v63, %v873_v32  ;;  %v409_v23 = vpop.permute.xlu1 %408  ;;  %v411_v5 = vpop.permute.xlu0 %410  ;;  %v787_v52 = vadd.f32 %v785_v8, %v779_v1  ;;  %v898_v43 = vadd.f32 %v896_v24, %v890_v49  ;;  %v895_v62 = vmul.f32 %v2395_v11, %v2081_v26  ;;  %s173_s24 = scalar_lea.vmem [#allocation7], %s2409_s14 }
 0x1a5   : > { %v413_v35 = vsel %vm412_vm11, %v407_v41, %v409_v23  ;;  %v381_v15 = vmul.f32 %v2397_v54, %v2396_v44  ;;  %v384_v37 = vmul.f32 %v2399_v53, %v2398_v27  ;;  %v891_v55 = vadd.f32 %v889_v57, %v879_v39  ;;  %v2404_v39 = vld [vmem:[#allocation26_spill] sm:$0xff]  ;;  %s967_s25 = sshll.u32 %s173_s24, 4  ;;  %s968_s25 = int_to_ptr.vmem [resolvable:$true] %s967_s25 }
 0x1a6   : > { %v417_v16 = vadd.f32 %v413_v35, %v390_v50  ;;  %792 = vrot.lane.b32.xlu1 %v787_v52, %s1316_s1  ;;  %v897_v47 = vadd.f32 %v895_v62, %v885_v6  ;;  %v2401_v4 = vstv %s1652_s28  ;;  %v414_v59 = vsel %vm412_vm11, %v409_v23, %v411_v5  ;;  %s1060_s28 = sld [smem:[#allocation6 + $0x32]]  ;;  %s1239_s8 = scalar_lea.vmem %s968_s25, 128 }
 0x1a7   : > { %v441_v31 = vmul.f32 %v2401_v4, %v2400_v28  ;;  %902 = vrot.lane.b32.xlu0 %v898_v43, %s1316_s1  ;;  %v446_v38 = vstv %s2153_s2  ;;  %v391_v29 = vadd.f32 %v389_v33, %v381_v15  ;;  %v396_v12 = vadd.f32 %v394_v60, %v384_v37  ;;  %p1240_p9 = scmp.ne.s32.totalorder %s968_s25, %s1239_s8  ;;  %p1246_p2 = scmp.lt.s32.totalorder %s968_s25, %s1244_s13 }
 0x1a8   : > { %v428_v18 = vpop.permute.xlu1 %427  ;;  %v430_v63 = vpop.permute.xlu0 %429  ;;  %v899_v48 = vadd.f32 %v897_v47, %v891_v55  ;;  %v395_v9 = vmul.f32 %v393_v19, %v1953_v21  ;;  %v2403_v13 = vmov %v2399_v53  ;;  %v452_v61 = vstv %s2160_s9  ;;  %v2406_v19 = vld [vmem:[#allocation27_spill] sm:$0xff]  ;;  %p1247_p1 = scmp.lt.s32.totalorder %s1245_s20, %s1239_s8 }
 0x1a9   : > { %v433_v7 = vsel %vm412_vm11, %v428_v18, %v430_v63  ;;  %v385_v10 = vmul.f32 %v2403_v13, %v2402_v51  ;;  %v458_v41 = vstv %s2165_s10  ;;  %v443_v45 = vadd.f32 %v441_v31, %v417_v16  ;;  %p1241_p13 = pnand %p1240_p9, %p2411_p11 }
 0x1aa   : > { %v418_v30 = vadd.f32 %v414_v59, %v391_v29  ;;  %v447_v25 = vmul.f32 %v446_v38, %v2018_v2  ;;  %v437_v3 = vadd.f32 %v433_v7, %v396_v12  ;;  %904 = vrot.lane.b32.xlu1 %v899_v48, %s1316_s1  ;;  %v2405_v20 = vmov %v2401_v4  ;;  %p1248_p0 = por %p1247_p1, %p1246_p2 }
 0x1ab   : > { %v442_v36 = vmul.f32 %v2405_v20, %v2404_v39  ;;  %v397_v21 = vadd.f32 %v395_v9, %v385_v10  ;;  %v453_v32 = vmul.f32 %v452_v61, %v2406_v19  ;;  %v459_v8 = vmul.f32 %v458_v41, %v2074_v14  ;;  %p1242_p10 = pneg %p1241_p13 }
 0x1ac   : > { %v449_v58 = vadd.f32 %v447_v25, %v437_v3  ;;  %v432_v1 = vpop.permute.xlu1 %431  ;;  %v448_v49 = vmul.f32 %v446_v38, %v2027_v22  ;;  %v454_v56 = vmul.f32 %v452_v61, %v2393_v46  ;;  %v460_v33 = vmul.f32 %v458_v41, %v2081_v26 }
 0x1ad   : > { %v434_v34 = vsel %vm412_vm11, %v430_v63, %v432_v1  ;;  %v444_v24 = vadd.f32 %v442_v36, %v418_v30  ;;  %v455_v2 = vadd.f32 %v453_v32, %v443_v45  ;;  %v377_v18 = vstv %s1060_s28  ;;  %p1249_p3 = pnand %p1248_p0, %p1242_p10 }
 0x1ae   : > { %v438_v42 = vadd.f32 %v434_v34, %v397_v21  ;;  %v461_v40 = vadd.f32 %v459_v8, %v449_v58 }
 0x1af   : > { %v456_v60 = vadd.f32 %v454_v56, %v444_v24 }
 0x1b0   : > { %v450_v50 = vadd.f32 %v448_v49, %v438_v42  ;;  %v463_v0 = vadd.f32 %v461_v40, %v455_v2 }
 0x1b2   : > { %467 = vrot.lane.b32.xlu0 %v463_v0, %s1316_s1  ;;  %v462_v17 = vadd.f32 %v460_v33, %v450_v50 }
 0x1b4   : > { %v464_v57 = vadd.f32 %v462_v17, %v456_v60  ;;  %v2407_v60 = vlaneseq }
 0x1b6   : > { %469 = vrot.lane.b32.xlu1 %v464_v57, %s1316_s1  ;;  %v939_v17 = vshrl.u32 %v2407_v60, 7 }
 0x1b8   : > { %v940_v57 = vsub.s32 0, %v939_v17 }
 0x20c   : > { %v567_v14 = vpop.permute.xlu0 %566 }
 0x20d   : > { %v573_v22 = vsel %vm471_vm14, 0.0, %v567_v14 }
 0x20e   : > { %577 = vrot.lane.b32.xlu0 %v573_v22, %s1317_s11 }
 0x210   : > { %v569_v6 = vpop.permute.xlu1 %568  ;;  %v679_v23 = vpop.permute.xlu0 %678 }
 0x211   : > { %v574_v5 = vsel %vm471_vm14, %v569_v6, 0.0  ;;  %v570_v46 = vsel %vm471_vm14, %v567_v14, %v569_v6  ;;  %v685_v52 = vsel %vm471_vm14, 0.0, %v679_v23 }
 0x212   : > { %581 = vrot.lane.b32.xlu0 %v574_v5, %s1317_s11  ;;  %579 = vrot.lane.b32.xlu1 %v570_v46, %s1317_s11  ;;  %v1195_v46 = vld [vmem:[%s1462_s19] sm:$0xff] }
 0x214   : > { %v681_v26 = vpop.permute.xlu1 %680 }
 0x215   : > { %v682_v43 = vsel %vm471_vm14, %v679_v23, %v681_v26  ;;  %v791_v11 = vpop.permute.xlu0 %790  ;;  %v686_v35 = vsel %vm471_vm14, %v681_v26, 0.0 }
 0x216   : > { %689 = vrot.lane.b32.xlu1 %v685_v52, %s1318_s12  ;;  %691 = vrot.lane.b32.xlu0 %v682_v43, %s1318_s12  ;;  %v797_v44 = vsel %vm471_vm14, 0.0, %v791_v11 }
 0x218   : > { %v793_v62 = vpop.permute.xlu1 %792 }
 0x219   : > { %v798_v54 = vsel %vm471_vm14, %v793_v62, 0.0  ;;  %v794_v15 = vsel %vm471_vm14, %v791_v11, %v793_v62  ;;  %v903_v16 = vpop.permute.xlu0 %902 }
 0x21a   : > { %693 = vrot.lane.b32.xlu1 %v686_v35, %s1318_s12  ;;  %801 = vrot.lane.b32.xlu0 %v797_v44, %s1319_s16  ;;  %v909_v53 = vsel %vm471_vm14, 0.0, %v903_v16 }
 0x21c   : > { %v905_v27 = vpop.permute.xlu1 %904 }
 0x21d   : > { %v906_v37 = vsel %vm471_vm14, %v903_v16, %v905_v27  ;;  %v910_v55 = vsel %vm471_vm14, %v905_v27, 0.0 }
 0x21e   : > { %805 = vrot.lane.b32.xlu0 %v798_v54, %s1319_s16  ;;  %803 = vrot.lane.b32.xlu1 %v794_v15, %s1319_s16 }
 0x222   : > { %913 = vrot.lane.b32.xlu1 %v909_v53, %s1320_s21  ;;  %915 = vrot.lane.b32.xlu0 %v906_v37, %s1320_s21 }
 0x224   : > { %v468_v47 = vpop.permute.xlu0 %467 }
 0x225   : > { %v475_v12 = vsel %vm471_vm14, 0.0, %v468_v47 }
 0x226   : > { %917 = vrot.lane.b32.xlu1 %v910_v55, %s1320_s21  ;;  %v476_v7 = vadd.f32 %v475_v12, %v377_v18 }
 0x228   : > { %v470_v28 = vpop.permute.xlu1 %469 }
 0x229   : > { %v472_v51 = vsel %vm471_vm14, %v468_v47, %v470_v28 }
 0x22a   : > { %v477_v25 = vadd.f32 %v472_v51, %v377_v18 }
 0x280   : > { %v578_v4 = vpop.permute.xlu0 %577 }
 0x284   : > { %v580_v31 = vpop.permute.xlu1 %579  ;;  %v582_v59 = vpop.permute.xlu0 %581 }
 0x285   : > { %v584_v9 = vsel %vm583_vm15, %v578_v4, %v580_v31  ;;  %v585_v45 = vsel %vm583_vm15, %v580_v31, %v582_v59 }
 0x286   : > { %v588_v10 = vadd.f32 %v584_v9, %v476_v7  ;;  %v589_v20 = vadd.f32 %v585_v45, %v477_v25 }
 0x288   : > { %v690_v38 = vpop.permute.xlu1 %689  ;;  %v692_v29 = vpop.permute.xlu0 %691 }
 0x289   : > { %v696_v13 = vsel %vm695_vm0, %v690_v38, %v692_v29 }
 0x28a   : > { %v700_v3 = vadd.f32 %v696_v13, %v588_v10 }
 0x28c   : > { %v694_v63 = vpop.permute.xlu1 %693  ;;  %v802_v48 = vpop.permute.xlu0 %801 }
 0x28d   : > { %v697_v39 = vsel %vm695_vm0, %v692_v29, %v694_v63 }
 0x28e   : > { %v701_v32 = vadd.f32 %v697_v39, %v589_v20 }
 0x290   : > { %v804_v61 = vpop.permute.xlu1 %803  ;;  %v806_v41 = vpop.permute.xlu0 %805 }
 0x291   : > { %v808_v30 = vsel %vm807_vm1, %v802_v48, %v804_v61  ;;  %v809_v21 = vsel %vm807_vm1, %v804_v61, %v806_v41 }
 0x292   : > { %v812_v36 = vadd.f32 %v808_v30, %v700_v3  ;;  %v813_v34 = vadd.f32 %v809_v21, %v701_v32 }
 0x294   : > { %v914_v58 = vpop.permute.xlu1 %913  ;;  %v916_v1 = vpop.permute.xlu0 %915 }
 0x295   : > { %v920_v19 = vsel %vm919_vm2, %v914_v58, %v916_v1 }
 0x296   : > { %v924_v8 = vadd.f32 %v920_v19, %v812_v36 }
 0x298   : > { %v1110_v49 = vmul.f32 -1.442695, %v924_v8  ;;  %v918_v24 = vpop.permute.xlu1 %917 }
 0x299   : > { %v921_v42 = vsel %vm919_vm2, %v916_v1, %v918_v24 }
 0x29a   : > { %1187 = vpow2.f32 %v1110_v49  ;;  %v925_v2 = vadd.f32 %v921_v42, %v813_v34 }
 0x29c   : > { %v1111_v40 = vmul.f32 -1.442695, %v925_v2 }
 0x29e   : > { %1189 = vpow2.f32 %v1111_v40 }
 0x2a7   : > { %v1188_v50 = vpop.eup %1187 }
 0x2a8   : > { %v932_v0 = vadd.f32 1.0, %v1188_v50 }
 0x2aa   : > { %1191 = vrcp.f32 %v932_v0 }
 0x2ab   : > { %v1190_v56 = vpop.eup %1189 }
 0x2ac   : > { %v933_v33 = vadd.f32 1.0, %v1190_v56 }
 0x2ae   : > { %1193 = vrcp.f32 %v933_v33 }
 0x2b7   : > { %v1192_v14 = vpop.eup %1191 }
 0x2b8   : > { %v941_v6 = vrot.slane %v1192_v14, %v940_v57 }
 0x2bb   : > { %v1194_v22 = vpop.eup %1193 }
 0x2bc   : > { %v945_v23 = vrot.slane %v1194_v22, %v940_v57 }
 0x2be   : > { %v948_v5 = vcombine.low %v941_v6, %v945_v23 }
 0x2c0   : > { %v950_v26 = vmul.f32 %v1195_v46, %v948_v5 }
 0x2c2   : > { %951 = vst [vmem:[%s173_s24] sm:$0xff] %v950_v26 }
 0x2c3   : > { %1252 = shalt.err (!%p1249_p3)
}
 0x2c4   : > { %s1253_s19 = scalar_lea.hbm %s965_s3, 128  ;;  %s1257_s17 = scalar_lea.hbm %s2410_s30, 256 }
 0x2c5   : > { %p1254_p12 = scmp.ne.s32.totalorder %s965_s3, %s1253_s19  ;;  %p1258_p4 = scmp.lt.s32.totalorder %s965_s3, %s2410_s30 }
 0x2c6   : > { %p1259_p6 = scmp.lt.s32.totalorder %s1257_s17, %s1253_s19 }
 0x2c7   : > { %p1255_p5 = pnand %p1254_p12, %p2411_p11 }
 0x2c8   : > { %p1260_p8 = por %p1259_p6, %p1258_p4 }
 0x2c9   : > { %p1256_p7 = pneg %p1255_p5 }
 0x2cb   : > { %p1261_p9 = pnand %p1260_p8, %p1256_p7 }
 0x2cd   : > { %1264 = shalt.err (!%p1261_p9)
}
 0x2ce   : > { %1125 = dma.vmem_to_hbm [thread:$0]  (%p2411_p11), %s968_s25, 128, %s965_s3, %s953_s4  }
 0x2cf PF: > { %s2412_s23 = sld [smem:[#allocation11_spill]] }
 0x2d0   : > { %s2413_s0 = sld [smem:[#allocation15_spill]] }
 0x2d1   : > { %s2414_s1 = sld [smem:[#allocation14_spill]] }
 0x2d5   : > { %s979_s2 = sand.u32 1, %s2412_s23  }
 0x2d6   : > { %p2415_p13 = scmp.ne.s32.totalorder %s2413_s0, 0  ;;  %s980_s9 = scalar_lea.sflag [#allocation4], %s979_s2 }
 0x2d7   : > { %p2416_p10 = scmp.ge.s32.totalorder %s2414_s1, 2 }
 0x2d9   : > { %p1136_p2 = pnand %p2416_p10, %p2415_p13 }
 0x2db   : > { %p1137_p1 = pneg %p1136_p2 }
 0x2dd   : > { %1290 = dma.done.wait (%p1137_p1), %s980_s9, 128  }
 0x2de   : > { %1292 = vsyncadd (%p1137_p1), %s980_s9, 4294967168  ;;  %s2417_s12 = sld [smem:[#allocation16_spill]] }
 0x2df   : > { %s2418_s9 = sld [smem:[#allocation12_spill]] }
 0x2e0   : > { %s2419_s10 = sld [smem:[#allocation13_spill]] }
 0x2e1   : > { %s2420_s11 = sld [smem:[#allocation17_spill]] }
 0x2e4   : > { %p16_p0 = scmp.ge.s32.totalorder %s2417_s12, 4  }
 0x2e6   :  { %18 = sbr.rel (!%p16_p0) target bundleno = 10 (0xa), region = 78 }
 0x2eb   :  { %985 = vsyncpa [#allocation3], 1 }
 0x2ec   :  { %987 = vsyncpa [#allocation3 + $0x1], 1 }
 0x2ed   :  { %988 = vsyncpa [#allocation4], 1 }
 0x2ee   :  { %990 = vsyncpa [#allocation4 + $0x1], 1 }
 0x2ef   :  { %991 = vsyncpa [#allocation5], 1 }
 0x2f0   :  { %993 = vsyncpa [#allocation5 + $0x1], 1 }

</bundles_post_ra>
